<compile_context>
chip_gen: v5e
topology: v5e:2x2
jax: 0.10.0
libtpu: 0.0.40
codegen_flags: <defaults>
</compile_context>

<pallas_src>
import functools

import jax
import jax.numpy as jnp
from jax.experimental import pallas as pl
from jax.experimental.pallas import tpu as pltpu

# ----------------------- small synthetic ViT config -----------------------
BATCH = 2
IN_CHANS = 3
IMG_SIZE = 16
PATCH = 8
GRID_HW = IMG_SIZE // PATCH            # 2
NUM_PATCHES = GRID_HW * GRID_HW        # 4
EMBED_DIM = 128                        # lane-dense hidden size
NUM_HEADS = 4
HEAD_DIM = EMBED_DIM // NUM_HEADS      # 32
MLP_DIM = 4 * EMBED_DIM                # 512
DEPTH = 3
SEQ = NUM_PATCHES + 1                  # CLS + patches = 5
ROWS = BATCH * SEQ                     # 10
ROWS_PAD = ((ROWS + 7) // 8) * 8       # 16 (sublane-aligned activation slab)
LN_EPS = 1e-6
SELECT_LAYER = -2                      # args.mm_vision_select_layer
SELECT_FEATURE = "patch"               # drops the CLS token

BLOCK_PARAM_ORDER = (
    "ln1_w", "ln1_b", "w_qkv", "b_qkv", "w_proj", "b_proj",
    "ln2_w", "ln2_b", "w_fc1", "b_fc1", "w_fc2", "b_fc2",
)
MATMUL_WEIGHTS = ("w_qkv", "w_proj", "w_fc1", "w_fc2")   # stored bf16 for MXU


# ------------------------------ kernel helpers -----------------------------
def _erf(x):
    # Abramowitz & Stegun 7.1.26 rational approximation (|err| < 1.5e-7).
    # TODO(synk): at production MLP sizes switch to tanh-approx GELU (EUP slot)
    # if exactness vs torch's erf GELU is negotiable.
    a1, a2, a3, a4, a5 = (0.254829592, -0.284496736, 1.421413741,
                          -1.453152027, 1.061405429)
    p = 0.3275911
    ax = jnp.abs(x)
    t = 1.0 / (1.0 + p * ax)
    poly = ((((a5 * t + a4) * t + a3) * t + a2) * t + a1) * t
    y = 1.0 - poly * jnp.exp(-ax * ax)
    return jnp.where(x >= 0.0, y, -y)


def _gelu_exact(x):
    # Matches torch.nn.GELU() default (exact erf form) used by timm's Mlp.
    return 0.5 * x * (1.0 + _erf(x * 0.7071067811865476))


def _layer_norm(v, w2d, b2d):
    mu = jnp.mean(v, axis=-1, keepdims=True)
    var = jnp.mean(jnp.square(v - mu), axis=-1, keepdims=True)
    return (v - mu) * jax.lax.rsqrt(var + LN_EPS) * w2d + b2d


# ---------------- patch_embed + CLS + pos_embed (one-shot kernel) ----------
def _embed_kernel(patches_ref, pw_ref, pb_ref, emb_ref, o_ref,
                  *, batch, seq, rows_pad, dim):
    tok = (jnp.dot(patches_ref[...], pw_ref[...],
                   preferred_element_type=jnp.float32) + pb_ref[...])
    emb = emb_ref[...]                                   # (SEQ, D); row0 = cls+pos0
    n_pat = seq - 1
    rows = []
    for b in range(batch):                               # static unroll
        rows.append(emb[0:1, :])
        rows.append(tok[b * n_pat:(b + 1) * n_pat, :] + emb[1:, :])
    pad = rows_pad - batch * seq
    if pad:
        # Zero the pad rows so later layers never see uninitialized VMEM bits.
        rows.append(jnp.zeros((pad, dim), jnp.float32))
    o_ref[...] = jnp.concatenate(rows, axis=0)           # one dense slab store


# --------------------------- fused tower kernel ----------------------------
def _tower_kernel(x0_ref,
                  ln1w_ref, ln1b_ref, wqkv_ref, bqkv_ref,
                  wproj_ref, bproj_ref, ln2w_ref, ln2b_ref,
                  wfc1_ref, bfc1_ref, wfc2_ref, bfc2_ref,
                  o_ref, ctx_vmem, *, batch, seq, num_heads):
    layer = pl.program_id(0)

    # o_ref is the VMEM-resident activation slab (constant out block index ->
    # accumulator pattern). It is initialized once and carried across layers.
    @pl.when(layer == 0)
    def _init():
        o_ref[...] = x0_ref[...]

    # norm_pre is Identity in this timm trunk (pre_norm=False) -> no-op.

    x = o_ref[...]                                       # (ROWS_PAD, D), f32
    rows, d = x.shape
    hd = d // num_heads
    scale = float(hd) ** -0.5

    # In-kernel block-diagonal (per-image) mask from iota batch-id compares.
    # Pad rows get their own batch id so they never leak into real rows.
    rid = jax.lax.broadcasted_iota(jnp.int32, (rows, rows), 0)
    cid = jax.lax.broadcasted_iota(jnp.int32, (rows, rows), 1)
    rbid = jnp.zeros((rows, rows), jnp.int32)
    cbid = jnp.zeros((rows, rows), jnp.int32)
    for b in range(1, batch + 1):                        # static, division-free
        rbid = rbid + (rid >= b * seq).astype(jnp.int32)
        cbid = cbid + (cid >= b * seq).astype(jnp.int32)
    same_img = rbid == cbid

    # ---- pre-LN MHSA -------------------------------------------------------
    h = _layer_norm(x, ln1w_ref[0], ln1b_ref[0])
    qkv = (jnp.dot(h.astype(jnp.bfloat16), wqkv_ref[0],
                   preferred_element_type=jnp.float32) + bqkv_ref[0])

    # TODO(synk): at production B*SEQ, restructure as per-(batch, head) batched
    # dot_general (or a batch grid axis) instead of the flattened-slab scores.
    for hix in range(num_heads):                         # static unroll
        qh = qkv[:, hix * hd:(hix + 1) * hd] * scale
        kh = qkv[:, d + hix * hd: d + (hix + 1) * hd]
        vh = qkv[:, 2 * d + hix * hd: 2 * d + (hix + 1) * hd]
        s = jax.lax.dot_general(qh, kh, (((1,), (1,)), ((), ())),
                                preferred_element_type=jnp.float32)
        s = jnp.where(same_img, s, -1e30)                # scores stay f32
        s = s - jnp.max(s, axis=-1, keepdims=True)
        e = jnp.exp(s)
        # approx reciprocal (EUP): ~1e-3 rel. error vs exact softmax denom.
        inv = pl.reciprocal(jnp.sum(e, axis=-1, keepdims=True), approx=True)
        ctx_vmem[:, hix * hd:(hix + 1) * hd] = jnp.dot(
            e * inv, vh, preferred_element_type=jnp.float32)

    x = x + (jnp.dot(ctx_vmem[...].astype(jnp.bfloat16), wproj_ref[0],
                     preferred_element_type=jnp.float32) + bproj_ref[0])

    # ---- pre-LN MLP --------------------------------------------------------
    h2 = _layer_norm(x, ln2w_ref[0], ln2b_ref[0])
    h2 = (jnp.dot(h2.astype(jnp.bfloat16), wfc1_ref[0],
                  preferred_element_type=jnp.float32) + bfc1_ref[0])
    h2 = _gelu_exact(h2)
    h2 = (jnp.dot(h2.astype(jnp.bfloat16), wfc2_ref[0],
                  preferred_element_type=jnp.float32) + bfc2_ref[0])
    o_ref[...] = x + h2                                  # single dense slab store

    # TODO(synk): the torch forward_hook also stashes per-block softmax
    # attention maps on CPU (side effect only, never returned) -- not emitted.


# ------------------------------ JAX wrappers -------------------------------
def _images_to_patches(images):
    # (B, C, H, W) -> (B*P, C*ph*pw), flattened in (C, ph, pw) order to match a
    # torch conv weight of shape (D, C, ph, pw) flattened to (D, C*ph*pw).
    b, c, _, _ = images.shape
    x = images.reshape(b, c, GRID_HW, PATCH, GRID_HW, PATCH)
    x = x.transpose(0, 2, 4, 1, 3, 5)
    return x.reshape(b * NUM_PATCHES, c * PATCH * PATCH)


def _num_blocks_needed(depth, select_layer):
    idx = select_layer if select_layer >= 0 else depth + 1 + select_layer
    if not 0 <= idx <= depth:
        raise ValueError(f"bad select_layer {select_layer} for depth {depth}")
    return idx


@jax.jit
def open_clip_vision_tower_forward(images, params):
    x32 = images.astype(jnp.float32)
    patches = _images_to_patches(x32)                    # (B*P, K)

    # Fold the CLS token into a per-position additive table (row0 = cls+pos0).
    pos = params["pos_embed"][0]                         # (SEQ, D)
    cls_row = params["cls_token"].reshape(1, EMBED_DIM) + pos[0:1, :]
    embed_add = jnp.concatenate([cls_row, pos[1:, :]], axis=0)   # (SEQ, D)

    # ---- patch_embed + _pos_embed as a tiny one-shot Pallas call -----------
    x0 = pl.pallas_call(
        functools.partial(_embed_kernel, batch=BATCH, seq=SEQ,
                          rows_pad=ROWS_PAD, dim=EMBED_DIM),
        out_shape=jax.ShapeDtypeStruct((ROWS_PAD, EMBED_DIM), jnp.float32),
    )(patches, params["patch_w"], params["patch_b"], embed_add)

    # Only the blocks needed for hidden_states[select_layer] are executed.
    n_layers = _num_blocks_needed(DEPTH, SELECT_LAYER)

    if n_layers == 0:
        slab = x0                                        # hidden_states[0]
    else:
        blk = {}
        for k in BLOCK_PARAM_ORDER:
            a = params["blocks"][k][:n_layers]
            if k in MATMUL_WEIGHTS:
                a = a.astype(jnp.bfloat16)               # MXU-friendly weights
            blk[k] = a

        kernel = functools.partial(_tower_kernel, batch=BATCH, seq=SEQ,
                                   num_heads=NUM_HEADS)

        def const_spec(a):
            nd = a.ndim
            return pl.BlockSpec(a.shape, lambda l, _n=nd: (0,) * _n)

        def layer_spec(a):
            nz = a.ndim - 1
            return pl.BlockSpec((1,) + a.shape[1:],
                                lambda l, _n=nz: (l,) + (0,) * _n)

        in_specs = [const_spec(x0)] + [layer_spec(blk[k])
                                       for k in BLOCK_PARAM_ORDER]

        # Advisory cost estimate so XLA schedules surrounding ops sensibly.
        per_layer_flops = (
            2 * ROWS_PAD * EMBED_DIM * 3 * EMBED_DIM            # qkv
            + 2 * NUM_HEADS * 2 * ROWS_PAD * ROWS_PAD * HEAD_DIM  # scores + pv
            + 2 * ROWS_PAD * EMBED_DIM * EMBED_DIM               # proj
            + 4 * ROWS_PAD * EMBED_DIM * MLP_DIM)                # fc1 + fc2
        weight_bytes = sum(int(blk[k].size) * blk[k].dtype.itemsize
                           for k in BLOCK_PARAM_ORDER)
        cost_est = pl.CostEstimate(
            flops=n_layers * per_layer_flops,
            transcendentals=n_layers * (NUM_HEADS * ROWS_PAD * ROWS_PAD
                                        + ROWS_PAD * MLP_DIM),
            bytes_accessed=weight_bytes + 2 * ROWS_PAD * EMBED_DIM * 4)

        slab = pl.pallas_call(
            kernel,
            grid=(n_layers,),
            in_specs=in_specs,
            out_specs=pl.BlockSpec((ROWS_PAD, EMBED_DIM), lambda l: (0, 0)),
            out_shape=jax.ShapeDtypeStruct((ROWS_PAD, EMBED_DIM), jnp.float32),
            scratch_shapes=[pltpu.VMEM((ROWS_PAD, EMBED_DIM), jnp.float32)],
            compiler_params=pltpu.CompilerParams(
                # Layers are sequential (VMEM-resident activation carry).
                # TODO(synk): at production sizes (D=768, MLP=3072) raise
                # vmem_limit_bytes (v5e/v6e) and K-tile w_fc1/w_fc2 + add a
                # 'parallel' batch-tile grid axis so v7x (64 MiB VMEM, 2 TCs)
                # fits and uses both cores.
                dimension_semantics=("arbitrary",)),
            cost_estimate=cost_est,
        )(x0, *[blk[k] for k in BLOCK_PARAM_ORDER])

    # ---- feature_select (cheap XLA slice on the dense slab) ----------------
    hidden = slab[:ROWS].reshape(BATCH, SEQ, EMBED_DIM)
    if SELECT_FEATURE == "patch":
        feats = hidden[:, 1:, :]
    elif SELECT_FEATURE == "cls_patch":
        feats = hidden
    else:
        raise ValueError(f"Unexpected select feature: {SELECT_FEATURE}")
    return feats.astype(images.dtype)


# --------------------------- deterministic params --------------------------
def init_params(key):
    keys = jax.random.split(key, 3 + DEPTH)
    params = {
        "patch_w": 0.02 * jax.random.normal(
            keys[0], (IN_CHANS * PATCH * PATCH, EMBED_DIM), jnp.float32),
        "patch_b": jnp.zeros((1, EMBED_DIM), jnp.float32),
        "cls_token": 0.02 * jax.random.normal(
            keys[1], (1, 1, EMBED_DIM), jnp.float32),
        "pos_embed": 0.02 * jax.random.normal(
            keys[2], (1, SEQ, EMBED_DIM), jnp.float32),
    }
    per_layer = []
    for i in range(DEPTH):
        bk = jax.random.split(keys[3 + i], 4)
        per_layer.append({
            "ln1_w": jnp.ones((1, EMBED_DIM), jnp.float32),
            "ln1_b": jnp.zeros((1, EMBED_DIM), jnp.float32),
            "w_qkv": 0.02 * jax.random.normal(
                bk[0], (EMBED_DIM, 3 * EMBED_DIM), jnp.float32),
            "b_qkv": jnp.zeros((1, 3 * EMBED_DIM), jnp.float32),
            "w_proj": 0.02 * jax.random.normal(
                bk[1], (EMBED_DIM, EMBED_DIM), jnp.float32),
            "b_proj": jnp.zeros((1, EMBED_DIM), jnp.float32),
            "ln2_w": jnp.ones((1, EMBED_DIM), jnp.float32),
            "ln2_b": jnp.zeros((1, EMBED_DIM), jnp.float32),
            "w_fc1": 0.02 * jax.random.normal(
                bk[2], (EMBED_DIM, MLP_DIM), jnp.float32),
            "b_fc1": jnp.zeros((1, MLP_DIM), jnp.float32),
            "w_fc2": 0.02 * jax.random.normal(
                bk[3], (MLP_DIM, EMBED_DIM), jnp.float32),
            "b_fc2": jnp.zeros((1, EMBED_DIM), jnp.float32),
        })
    # Stack per-layer params along a leading L axis (selected by index_map).
    params["blocks"] = {k: jnp.stack([lp[k] for lp in per_layer], axis=0)
                        for k in BLOCK_PARAM_ORDER}
    return params


if __name__ == "__main__":
    root = jax.random.PRNGKey(0)
    pkey, ikey = jax.random.split(root)
    params = init_params(pkey)
    # NCHW images, like the torch module's pixel_values.
    images = jax.random.normal(ikey, (BATCH, IN_CHANS, IMG_SIZE, IMG_SIZE),
                               jnp.float32)
    feats = open_clip_vision_tower_forward(images, params)
    jax.block_until_ready(feats)
    assert feats.shape == (BATCH, NUM_PATCHES, EMBED_DIM), feats.shape
    assert feats.dtype == images.dtype
    print("KERNEL_OK")
</pallas_src>

<mosaic_0001>
module attributes {stable_mosaic.version = 11 : i64} {
  func.func @_embed_kernel(%arg0: memref<8x192xf32, #tpu.memory_space<vmem>>, %arg1: memref<192x128xf32, #tpu.memory_space<vmem>>, %arg2: memref<1x128xf32, #tpu.memory_space<vmem>>, %arg3: memref<5x128xf32, #tpu.memory_space<vmem>>, %arg4: memref<16x128xf32, #tpu.memory_space<vmem>>) attributes {dimension_semantics = [], scalar_prefetch = 0 : i64, scratch_operands = 0 : i64, tpu.core_type = #tpu.core_type<tc>} {
    %c0 = arith.constant 0 : index
    %c0_0 = arith.constant 0 : index
    %0 = vector.load %arg0[%c0, %c0_0] : memref<8x192xf32, #tpu.memory_space<vmem>>, vector<8x192xf32>
    %c0_1 = arith.constant 0 : index
    %c0_2 = arith.constant 0 : index
    %1 = vector.load %arg1[%c0_1, %c0_2] : memref<192x128xf32, #tpu.memory_space<vmem>>, vector<192x128xf32>
    %cst = arith.constant dense<0.000000e+00> : vector<8x128xf32>
    %2 = tpu.matmul %0, %1, %cst {dimension_numbers = #tpu.dot_dimension_numbers<[1], [0], [0], [1], [0, 0, 1, 1], [], []>} : vector<8x192xf32>, vector<192x128xf32>, vector<8x128xf32> -> vector<8x128xf32>
    %c0_3 = arith.constant 0 : index
    %c0_4 = arith.constant 0 : index
    %3 = vector.load %arg2[%c0_3, %c0_4] : memref<1x128xf32, #tpu.memory_space<vmem>>, vector<1x128xf32>
    %4 = vector.broadcast %3 : vector<1x128xf32> to vector<8x128xf32>
    %5 = arith.addf %2, %4 : vector<8x128xf32>
    %c0_5 = arith.constant 0 : index
    %c0_6 = arith.constant 0 : index
    %6 = vector.load %arg3[%c0_5, %c0_6] : memref<5x128xf32, #tpu.memory_space<vmem>>, vector<5x128xf32>
    %7 = vector.extract_strided_slice %6 {offsets = [0, 0], sizes = [1, 128], strides = [1, 1]} : vector<5x128xf32> to vector<1x128xf32>
    %8 = vector.extract_strided_slice %5 {offsets = [0, 0], sizes = [4, 128], strides = [1, 1]} : vector<8x128xf32> to vector<4x128xf32>
    %9 = vector.extract_strided_slice %6 {offsets = [1, 0], sizes = [4, 128], strides = [1, 1]} : vector<5x128xf32> to vector<4x128xf32>
    %10 = arith.addf %8, %9 : vector<4x128xf32>
    %11 = vector.extract_strided_slice %6 {offsets = [0, 0], sizes = [1, 128], strides = [1, 1]} : vector<5x128xf32> to vector<1x128xf32>
    %12 = vector.extract_strided_slice %5 {offsets = [4, 0], sizes = [4, 128], strides = [1, 1]} : vector<8x128xf32> to vector<4x128xf32>
    %13 = vector.extract_strided_slice %6 {offsets = [1, 0], sizes = [4, 128], strides = [1, 1]} : vector<5x128xf32> to vector<4x128xf32>
    %14 = arith.addf %12, %13 : vector<4x128xf32>
    %cst_7 = arith.constant 0.000000e+00 : f32
    %15 = vector.broadcast %cst_7 : f32 to vector<6x128xf32>
    %16 = tpu.concatenate %7, %10, %11, %14, %15 in 0 : vector<1x128xf32>, vector<4x128xf32>, vector<1x128xf32>, vector<4x128xf32>, vector<6x128xf32> -> vector<16x128xf32>
    %c0_8 = arith.constant 0 : index
    %c0_9 = arith.constant 0 : index
    %17 = vector.load %arg4[%c0_8, %c0_9] : memref<16x128xf32, #tpu.memory_space<vmem>>, vector<16x128xf32>
    tpu.vector_store %arg4[%c0_8, %c0_9], %16 {strides = array<i32>} : memref<16x128xf32, #tpu.memory_space<vmem>>, vector<16x128xf32>,
    return
  }
}

module attributes {stable_mosaic.version = 11 : i64} {
  func.func @_tower_kernel(%arg0: i32, %arg1: memref<16x128xf32, #tpu.memory_space<vmem>>, %arg2: memref<1x1x128xf32, #tpu.memory_space<vmem>>, %arg3: memref<1x1x128xf32, #tpu.memory_space<vmem>>, %arg4: memref<1x128x384xbf16, #tpu.memory_space<vmem>>, %arg5: memref<1x1x384xf32, #tpu.memory_space<vmem>>, %arg6: memref<1x128x128xbf16, #tpu.memory_space<vmem>>, %arg7: memref<1x1x128xf32, #tpu.memory_space<vmem>>, %arg8: memref<1x1x128xf32, #tpu.memory_space<vmem>>, %arg9: memref<1x1x128xf32, #tpu.memory_space<vmem>>, %arg10: memref<1x128x512xbf16, #tpu.memory_space<vmem>>, %arg11: memref<1x1x512xf32, #tpu.memory_space<vmem>>, %arg12: memref<1x512x128xbf16, #tpu.memory_space<vmem>>, %arg13: memref<1x1x128xf32, #tpu.memory_space<vmem>>, %arg14: memref<16x128xf32, #tpu.memory_space<vmem>>, %arg15: memref<16x128xf32, #tpu.memory_space<vmem>>) attributes {dimension_semantics = [#tpu.dimension_semantics<arbitrary>], iteration_bounds = array<i64: 2>, scalar_prefetch = 0 : i64, scratch_operands = 1 : i64, tpu.core_type = #tpu.core_type<tc>, window_params = [{pipeline_mode = #tpu.pipeline_mode<synchronous>, transform_indices = @transform_0, window_bounds = array<i64: 16, 128>}, {transform_indices = @transform_1, window_bounds = array<i64: 1, 1, 128>}, {transform_indices = @transform_2, window_bounds = array<i64: 1, 1, 128>}, {transform_indices = @transform_3, window_bounds = array<i64: 1, 128, 384>}, {transform_indices = @transform_4, window_bounds = array<i64: 1, 1, 384>}, {transform_indices = @transform_5, window_bounds = array<i64: 1, 128, 128>}, {transform_indices = @transform_6, window_bounds = array<i64: 1, 1, 128>}, {transform_indices = @transform_7, window_bounds = array<i64: 1, 1, 128>}, {transform_indices = @transform_8, window_bounds = array<i64: 1, 1, 128>}, {transform_indices = @transform_9, window_bounds = array<i64: 1, 128, 512>}, {transform_indices = @transform_10, window_bounds = array<i64: 1, 1, 512>}, {transform_indices = @transform_11, window_bounds = array<i64: 1, 512, 128>}, {transform_indices = @transform_12, window_bounds = array<i64: 1, 1, 128>}, {pipeline_mode = #tpu.pipeline_mode<synchronous>, transform_indices = @transform_13, window_bounds = array<i64: 16, 128>}]} {
    %c0_i32 = arith.constant 0 : i32
    %0 = arith.cmpi eq, %arg0, %c0_i32 : i32
    %1 = arith.extui %0 : i1 to i32
    %c0_i32_0 = arith.constant 0 : i32
    %2 = arith.cmpi ne, %1, %c0_i32_0 : i32
    scf.if %2 {
      %c0_103 = arith.constant 0 : index
      %c0_104 = arith.constant 0 : index
      %233 = vector.load %arg1[%c0_103, %c0_104] : memref<16x128xf32, #tpu.memory_space<vmem>>, vector<16x128xf32>
      %c0_105 = arith.constant 0 : index
      %c0_106 = arith.constant 0 : index
      %234 = vector.load %arg14[%c0_105, %c0_106] : memref<16x128xf32, #tpu.memory_space<vmem>>, vector<16x128xf32>
      tpu.vector_store %arg14[%c0_105, %c0_106], %233 {strides = array<i32>} : memref<16x128xf32, #tpu.memory_space<vmem>>, vector<16x128xf32>,
    } else {
    }
    %c0 = arith.constant 0 : index
    %c0_1 = arith.constant 0 : index
    %3 = vector.load %arg14[%c0, %c0_1] : memref<16x128xf32, #tpu.memory_space<vmem>>, vector<16x128xf32>
    %4 = tpu.iota {dimensions = array<i32: 0>} : vector<16x16xi32>
    %5 = tpu.iota {dimensions = array<i32: 1>} : vector<16x16xi32>
    %c0_i32_2 = arith.constant 0 : i32
    %6 = vector.broadcast %c0_i32_2 : i32 to vector<16x16xi32>
    %c0_i32_3 = arith.constant 0 : i32
    %7 = vector.broadcast %c0_i32_3 : i32 to vector<16x16xi32>
    %c5_i32 = arith.constant 5 : i32
    %8 = vector.broadcast %c5_i32 : i32 to vector<16x16xi32>
    %9 = arith.cmpi sge, %4, %8 : vector<16x16xi32>
    %10 = arith.extui %9 : vector<16x16xi1> to vector<16x16xi32>
    %11 = arith.addi %6, %10 : vector<16x16xi32>
    %c5_i32_4 = arith.constant 5 : i32
    %12 = vector.broadcast %c5_i32_4 : i32 to vector<16x16xi32>
    %13 = arith.cmpi sge, %5, %12 : vector<16x16xi32>
    %14 = arith.extui %13 : vector<16x16xi1> to vector<16x16xi32>
    %15 = arith.addi %7, %14 : vector<16x16xi32>
    %c10_i32 = arith.constant 10 : i32
    %16 = vector.broadcast %c10_i32 : i32 to vector<16x16xi32>
    %17 = arith.cmpi sge, %4, %16 : vector<16x16xi32>
    %18 = arith.extui %17 : vector<16x16xi1> to vector<16x16xi32>
    %19 = arith.addi %11, %18 : vector<16x16xi32>
    %c10_i32_5 = arith.constant 10 : i32
    %20 = vector.broadcast %c10_i32_5 : i32 to vector<16x16xi32>
    %21 = arith.cmpi sge, %5, %20 : vector<16x16xi32>
    %22 = arith.extui %21 : vector<16x16xi1> to vector<16x16xi32>
    %23 = arith.addi %15, %22 : vector<16x16xi32>
    %24 = arith.cmpi eq, %19, %23 : vector<16x16xi32>
    %c0_6 = arith.constant 0 : index
    %c0_7 = arith.constant 0 : index
    %c0_8 = arith.constant 0 : index
    %25 = vector.load %arg2[%c0_6, %c0_7, %c0_8] : memref<1x1x128xf32, #tpu.memory_space<vmem>>, vector<1x1x128xf32>
    %26 = vector.shape_cast %25 : vector<1x1x128xf32> to vector<1x128xf32>
    %c0_9 = arith.constant 0 : index
    %c0_10 = arith.constant 0 : index
    %c0_11 = arith.constant 0 : index
    %27 = vector.load %arg3[%c0_9, %c0_10, %c0_11] : memref<1x1x128xf32, #tpu.memory_space<vmem>>, vector<1x1x128xf32>
    %28 = vector.shape_cast %27 : vector<1x1x128xf32> to vector<1x128xf32>
    %cst = arith.constant dense<0.000000e+00> : vector<16xf32>
    %29 = vector.multi_reduction <add>, %3, %cst [1] : vector<16x128xf32> to vector<16xf32>
    %30 = vector.shape_cast %29 : vector<16xf32> to vector<16x1xf32>
    %cst_12 = arith.constant 1.280000e+02 : f32
    %31 = vector.broadcast %cst_12 : f32 to vector<16x1xf32>
    %32 = arith.divf %30, %31 : vector<16x1xf32>
    %33 = vector.broadcast %32 : vector<16x1xf32> to vector<16x128xf32>
    %34 = arith.subf %3, %33 : vector<16x128xf32>
    %35 = arith.mulf %34, %34 : vector<16x128xf32>
    %cst_13 = arith.constant dense<0.000000e+00> : vector<16xf32>
    %36 = vector.multi_reduction <add>, %35, %cst_13 [1] : vector<16x128xf32> to vector<16xf32>
    %37 = vector.shape_cast %36 : vector<16xf32> to vector<16x1xf32>
    %cst_14 = arith.constant 1.280000e+02 : f32
    %38 = vector.broadcast %cst_14 : f32 to vector<16x1xf32>
    %39 = arith.divf %37, %38 : vector<16x1xf32>
    %40 = vector.broadcast %32 : vector<16x1xf32> to vector<16x128xf32>
    %41 = arith.subf %3, %40 : vector<16x128xf32>
    %cst_15 = arith.constant 9.99999997E-7 : f32
    %42 = vector.broadcast %cst_15 : f32 to vector<16x1xf32>
    %43 = arith.addf %39, %42 : vector<16x1xf32>
    %44 = math.rsqrt %43 : vector<16x1xf32>
    %45 = vector.broadcast %44 : vector<16x1xf32> to vector<16x128xf32>
    %46 = arith.mulf %41, %45 : vector<16x128xf32>
    %47 = vector.broadcast %26 : vector<1x128xf32> to vector<16x128xf32>
    %48 = arith.mulf %46, %47 : vector<16x128xf32>
    %49 = vector.broadcast %28 : vector<1x128xf32> to vector<16x128xf32>
    %50 = arith.addf %48, %49 : vector<16x128xf32>
    %51 = arith.truncf %50 : vector<16x128xf32> to vector<16x128xbf16>
    %c0_16 = arith.constant 0 : index
    %c0_17 = arith.constant 0 : index
    %c0_18 = arith.constant 0 : index
    %52 = vector.load %arg4[%c0_16, %c0_17, %c0_18] : memref<1x128x384xbf16, #tpu.memory_space<vmem>>, vector<1x128x384xbf16>
    %53 = vector.shape_cast %52 : vector<1x128x384xbf16> to vector<128x384xbf16>
    %cst_19 = arith.constant dense<0.000000e+00> : vector<16x384xf32>
    %54 = tpu.matmul %51, %53, %cst_19 {dimension_numbers = #tpu.dot_dimension_numbers<[1], [0], [0], [1], [0, 0, 1, 1], [], []>} : vector<16x128xbf16>, vector<128x384xbf16>, vector<16x384xf32> -> vector<16x384xf32>
    %c0_20 = arith.constant 0 : index
    %c0_21 = arith.constant 0 : index
    %c0_22 = arith.constant 0 : index
    %55 = vector.load %arg5[%c0_20, %c0_21, %c0_22] : memref<1x1x384xf32, #tpu.memory_space<vmem>>, vector<1x1x384xf32>
    %56 = vector.shape_cast %55 : vector<1x1x384xf32> to vector<1x384xf32>
    %57 = vector.broadcast %56 : vector<1x384xf32> to vector<16x384xf32>
    %58 = arith.addf %54, %57 : vector<16x384xf32>
    %59 = vector.extract_strided_slice %58 {offsets = [0, 0], sizes = [16, 32], strides = [1, 1]} : vector<16x384xf32> to vector<16x32xf32>
    %cst_23 = arith.constant 0.176776692 : f32
    %60 = vector.broadcast %cst_23 : f32 to vector<16x32xf32>
    %61 = arith.mulf %59, %60 : vector<16x32xf32>
    %62 = vector.extract_strided_slice %58 {offsets = [0, 128], sizes = [16, 32], strides = [1, 1]} : vector<16x384xf32> to vector<16x32xf32>
    %63 = vector.extract_strided_slice %58 {offsets = [0, 256], sizes = [16, 32], strides = [1, 1]} : vector<16x384xf32> to vector<16x32xf32>
    %cst_24 = arith.constant dense<0.000000e+00> : vector<16x16xf32>
    %64 = tpu.matmul %61, %62, %cst_24 {dimension_numbers = #tpu.dot_dimension_numbers<[1], [1], [0], [0], [0, 0, 1, 0], [], []>} : vector<16x32xf32>, vector<16x32xf32>, vector<16x16xf32> -> vector<16x16xf32>
    %cst_25 = arith.constant -1.000000e+30 : f32
    %65 = vector.broadcast %cst_25 : f32 to vector<16x16xf32>
    %66 = arith.select %24, %64, %65 : vector<16x16xi1>, vector<16x16xf32>
    %cst_26 = arith.constant dense<0xFF800000> : vector<16xf32>
    %67 = vector.multi_reduction <maximumf>, %66, %cst_26 [1] : vector<16x16xf32> to vector<16xf32>
    %68 = vector.shape_cast %67 : vector<16xf32> to vector<16x1xf32>
    %69 = vector.broadcast %68 : vector<16x1xf32> to vector<16x16xf32>
    %70 = arith.subf %66, %69 : vector<16x16xf32>
    %71 = math.exp %70 : vector<16x16xf32>
    %cst_27 = arith.constant dense<0.000000e+00> : vector<16xf32>
    %72 = vector.multi_reduction <add>, %71, %cst_27 [1] : vector<16x16xf32> to vector<16xf32>
    %73 = vector.shape_cast %72 : vector<16xf32> to vector<16x1xf32>
    %74 = tpu.reciprocal %73 {approx = true} : vector<16x1xf32> -> vector<16x1xf32>
    %75 = vector.broadcast %74 : vector<16x1xf32> to vector<16x16xf32>
    %76 = arith.mulf %71, %75 : vector<16x16xf32>
    %cst_28 = arith.constant dense<0.000000e+00> : vector<16x32xf32>
    %77 = tpu.matmul %76, %63, %cst_28 {dimension_numbers = #tpu.dot_dimension_numbers<[1], [0], [0], [1], [0, 0, 1, 1], [], []>} : vector<16x16xf32>, vector<16x32xf32>, vector<16x32xf32> -> vector<16x32xf32>
    %c0_29 = arith.constant 0 : index
    %c0_30 = arith.constant 0 : index
    %78 = vector.load %arg15[%c0_29, %c0_30] : memref<16x128xf32, #tpu.memory_space<vmem>>, vector<16x32xf32>
    tpu.vector_store %arg15[%c0_29, %c0_30], %77 {strides = array<i32>} : memref<16x128xf32, #tpu.memory_space<vmem>>, vector<16x32xf32>,
    %79 = vector.extract_strided_slice %58 {offsets = [0, 32], sizes = [16, 32], strides = [1, 1]} : vector<16x384xf32> to vector<16x32xf32>
    %cst_31 = arith.constant 0.176776692 : f32
    %80 = vector.broadcast %cst_31 : f32 to vector<16x32xf32>
    %81 = arith.mulf %79, %80 : vector<16x32xf32>
    %82 = vector.extract_strided_slice %58 {offsets = [0, 160], sizes = [16, 32], strides = [1, 1]} : vector<16x384xf32> to vector<16x32xf32>
    %83 = vector.extract_strided_slice %58 {offsets = [0, 288], sizes = [16, 32], strides = [1, 1]} : vector<16x384xf32> to vector<16x32xf32>
    %cst_32 = arith.constant dense<0.000000e+00> : vector<16x16xf32>
    %84 = tpu.matmul %81, %82, %cst_32 {dimension_numbers = #tpu.dot_dimension_numbers<[1], [1], [0], [0], [0, 0, 1, 0], [], []>} : vector<16x32xf32>, vector<16x32xf32>, vector<16x16xf32> -> vector<16x16xf32>
    %cst_33 = arith.constant -1.000000e+30 : f32
    %85 = vector.broadcast %cst_33 : f32 to vector<16x16xf32>
    %86 = arith.select %24, %84, %85 : vector<16x16xi1>, vector<16x16xf32>
    %cst_34 = arith.constant dense<0xFF800000> : vector<16xf32>
    %87 = vector.multi_reduction <maximumf>, %86, %cst_34 [1] : vector<16x16xf32> to vector<16xf32>
    %88 = vector.shape_cast %87 : vector<16xf32> to vector<16x1xf32>
    %89 = vector.broadcast %88 : vector<16x1xf32> to vector<16x16xf32>
    %90 = arith.subf %86, %89 : vector<16x16xf32>
    %91 = math.exp %90 : vector<16x16xf32>
    %cst_35 = arith.constant dense<0.000000e+00> : vector<16xf32>
    %92 = vector.multi_reduction <add>, %91, %cst_35 [1] : vector<16x16xf32> to vector<16xf32>
    %93 = vector.shape_cast %92 : vector<16xf32> to vector<16x1xf32>
    %94 = tpu.reciprocal %93 {approx = true} : vector<16x1xf32> -> vector<16x1xf32>
    %95 = vector.broadcast %94 : vector<16x1xf32> to vector<16x16xf32>
    %96 = arith.mulf %91, %95 : vector<16x16xf32>
    %cst_36 = arith.constant dense<0.000000e+00> : vector<16x32xf32>
    %97 = tpu.matmul %96, %83, %cst_36 {dimension_numbers = #tpu.dot_dimension_numbers<[1], [0], [0], [1], [0, 0, 1, 1], [], []>} : vector<16x16xf32>, vector<16x32xf32>, vector<16x32xf32> -> vector<16x32xf32>
    %c0_37 = arith.constant 0 : index
    %c32 = arith.constant 32 : index
    %98 = vector.load %arg15[%c0_37, %c32] : memref<16x128xf32, #tpu.memory_space<vmem>>, vector<16x32xf32>
    tpu.vector_store %arg15[%c0_37, %c32], %97 {strides = array<i32>} : memref<16x128xf32, #tpu.memory_space<vmem>>, vector<16x32xf32>,
    %99 = vector.extract_strided_slice %58 {offsets = [0, 64], sizes = [16, 32], strides = [1, 1]} : vector<16x384xf32> to vector<16x32xf32>
    %cst_38 = arith.constant 0.176776692 : f32
    %100 = vector.broadcast %cst_38 : f32 to vector<16x32xf32>
    %101 = arith.mulf %99, %100 : vector<16x32xf32>
    %102 = vector.extract_strided_slice %58 {offsets = [0, 192], sizes = [16, 32], strides = [1, 1]} : vector<16x384xf32> to vector<16x32xf32>
    %103 = vector.extract_strided_slice %58 {offsets = [0, 320], sizes = [16, 32], strides = [1, 1]} : vector<16x384xf32> to vector<16x32xf32>
    %cst_39 = arith.constant dense<0.000000e+00> : vector<16x16xf32>
    %104 = tpu.matmul %101, %102, %cst_39 {dimension_numbers = #tpu.dot_dimension_numbers<[1], [1], [0], [0], [0, 0, 1, 0], [], []>} : vector<16x32xf32>, vector<16x32xf32>, vector<16x16xf32> -> vector<16x16xf32>
    %cst_40 = arith.constant -1.000000e+30 : f32
    %105 = vector.broadcast %cst_40 : f32 to vector<16x16xf32>
    %106 = arith.select %24, %104, %105 : vector<16x16xi1>, vector<16x16xf32>
    %cst_41 = arith.constant dense<0xFF800000> : vector<16xf32>
    %107 = vector.multi_reduction <maximumf>, %106, %cst_41 [1] : vector<16x16xf32> to vector<16xf32>
    %108 = vector.shape_cast %107 : vector<16xf32> to vector<16x1xf32>
    %109 = vector.broadcast %108 : vector<16x1xf32> to vector<16x16xf32>
    %110 = arith.subf %106, %109 : vector<16x16xf32>
    %111 = math.exp %110 : vector<16x16xf32>
    %cst_42 = arith.constant dense<0.000000e+00> : vector<16xf32>
    %112 = vector.multi_reduction <add>, %111, %cst_42 [1] : vector<16x16xf32> to vector<16xf32>
    %113 = vector.shape_cast %112 : vector<16xf32> to vector<16x1xf32>
    %114 = tpu.reciprocal %113 {approx = true} : vector<16x1xf32> -> vector<16x1xf32>
    %115 = vector.broadcast %114 : vector<16x1xf32> to vector<16x16xf32>
    %116 = arith.mulf %111, %115 : vector<16x16xf32>
    %cst_43 = arith.constant dense<0.000000e+00> : vector<16x32xf32>
    %117 = tpu.matmul %116, %103, %cst_43 {dimension_numbers = #tpu.dot_dimension_numbers<[1], [0], [0], [1], [0, 0, 1, 1], [], []>} : vector<16x16xf32>, vector<16x32xf32>, vector<16x32xf32> -> vector<16x32xf32>
    %c0_44 = arith.constant 0 : index
    %c64 = arith.constant 64 : index
    %118 = vector.load %arg15[%c0_44, %c64] : memref<16x128xf32, #tpu.memory_space<vmem>>, vector<16x32xf32>
    tpu.vector_store %arg15[%c0_44, %c64], %117 {strides = array<i32>} : memref<16x128xf32, #tpu.memory_space<vmem>>, vector<16x32xf32>,
    %119 = vector.extract_strided_slice %58 {offsets = [0, 96], sizes = [16, 32], strides = [1, 1]} : vector<16x384xf32> to vector<16x32xf32>
    %cst_45 = arith.constant 0.176776692 : f32
    %120 = vector.broadcast %cst_45 : f32 to vector<16x32xf32>
    %121 = arith.mulf %119, %120 : vector<16x32xf32>
    %122 = vector.extract_strided_slice %58 {offsets = [0, 224], sizes = [16, 32], strides = [1, 1]} : vector<16x384xf32> to vector<16x32xf32>
    %123 = vector.extract_strided_slice %58 {offsets = [0, 352], sizes = [16, 32], strides = [1, 1]} : vector<16x384xf32> to vector<16x32xf32>
    %cst_46 = arith.constant dense<0.000000e+00> : vector<16x16xf32>
    %124 = tpu.matmul %121, %122, %cst_46 {dimension_numbers = #tpu.dot_dimension_numbers<[1], [1], [0], [0], [0, 0, 1, 0], [], []>} : vector<16x32xf32>, vector<16x32xf32>, vector<16x16xf32> -> vector<16x16xf32>
    %cst_47 = arith.constant -1.000000e+30 : f32
    %125 = vector.broadcast %cst_47 : f32 to vector<16x16xf32>
    %126 = arith.select %24, %124, %125 : vector<16x16xi1>, vector<16x16xf32>
    %cst_48 = arith.constant dense<0xFF800000> : vector<16xf32>
    %127 = vector.multi_reduction <maximumf>, %126, %cst_48 [1] : vector<16x16xf32> to vector<16xf32>
    %128 = vector.shape_cast %127 : vector<16xf32> to vector<16x1xf32>
    %129 = vector.broadcast %128 : vector<16x1xf32> to vector<16x16xf32>
    %130 = arith.subf %126, %129 : vector<16x16xf32>
    %131 = math.exp %130 : vector<16x16xf32>
    %cst_49 = arith.constant dense<0.000000e+00> : vector<16xf32>
    %132 = vector.multi_reduction <add>, %131, %cst_49 [1] : vector<16x16xf32> to vector<16xf32>
    %133 = vector.shape_cast %132 : vector<16xf32> to vector<16x1xf32>
    %134 = tpu.reciprocal %133 {approx = true} : vector<16x1xf32> -> vector<16x1xf32>
    %135 = vector.broadcast %134 : vector<16x1xf32> to vector<16x16xf32>
    %136 = arith.mulf %131, %135 : vector<16x16xf32>
    %cst_50 = arith.constant dense<0.000000e+00> : vector<16x32xf32>
    %137 = tpu.matmul %136, %123, %cst_50 {dimension_numbers = #tpu.dot_dimension_numbers<[1], [0], [0], [1], [0, 0, 1, 1], [], []>} : vector<16x16xf32>, vector<16x32xf32>, vector<16x32xf32> -> vector<16x32xf32>
    %c0_51 = arith.constant 0 : index
    %c96 = arith.constant 96 : index
    %138 = vector.load %arg15[%c0_51, %c96] : memref<16x128xf32, #tpu.memory_space<vmem>>, vector<16x32xf32>
    tpu.vector_store %arg15[%c0_51, %c96], %137 {strides = array<i32>} : memref<16x128xf32, #tpu.memory_space<vmem>>, vector<16x32xf32>,
    %c0_52 = arith.constant 0 : index
    %c0_53 = arith.constant 0 : index
    %139 = vector.load %arg15[%c0_52, %c0_53] : memref<16x128xf32, #tpu.memory_space<vmem>>, vector<16x128xf32>
    %140 = arith.truncf %139 : vector<16x128xf32> to vector<16x128xbf16>
    %c0_54 = arith.constant 0 : index
    %c0_55 = arith.constant 0 : index
    %c0_56 = arith.constant 0 : index
    %141 = vector.load %arg6[%c0_54, %c0_55, %c0_56] : memref<1x128x128xbf16, #tpu.memory_space<vmem>>, vector<1x128x128xbf16>
    %142 = vector.shape_cast %141 : vector<1x128x128xbf16> to vector<128x128xbf16>
    %cst_57 = arith.constant dense<0.000000e+00> : vector<16x128xf32>
    %143 = tpu.matmul %140, %142, %cst_57 {dimension_numbers = #tpu.dot_dimension_numbers<[1], [0], [0], [1], [0, 0, 1, 1], [], []>} : vector<16x128xbf16>, vector<128x128xbf16>, vector<16x128xf32> -> vector<16x128xf32>
    %c0_58 = arith.constant 0 : index
    %c0_59 = arith.constant 0 : index
    %c0_60 = arith.constant 0 : index
    %144 = vector.load %arg7[%c0_58, %c0_59, %c0_60] : memref<1x1x128xf32, #tpu.memory_space<vmem>>, vector<1x1x128xf32>
    %145 = vector.shape_cast %144 : vector<1x1x128xf32> to vector<1x128xf32>
    %146 = vector.broadcast %145 : vector<1x128xf32> to vector<16x128xf32>
    %147 = arith.addf %143, %146 : vector<16x128xf32>
    %148 = arith.addf %3, %147 : vector<16x128xf32>
    %c0_61 = arith.constant 0 : index
    %c0_62 = arith.constant 0 : index
    %c0_63 = arith.constant 0 : index
    %149 = vector.load %arg8[%c0_61, %c0_62, %c0_63] : memref<1x1x128xf32, #tpu.memory_space<vmem>>, vector<1x1x128xf32>
    %150 = vector.shape_cast %149 : vector<1x1x128xf32> to vector<1x128xf32>
    %c0_64 = arith.constant 0 : index
    %c0_65 = arith.constant 0 : index
    %c0_66 = arith.constant 0 : index
    %151 = vector.load %arg9[%c0_64, %c0_65, %c0_66] : memref<1x1x128xf32, #tpu.memory_space<vmem>>, vector<1x1x128xf32>
    %152 = vector.shape_cast %151 : vector<1x1x128xf32> to vector<1x128xf32>
    %cst_67 = arith.constant dense<0.000000e+00> : vector<16xf32>
    %153 = vector.multi_reduction <add>, %148, %cst_67 [1] : vector<16x128xf32> to vector<16xf32>
    %154 = vector.shape_cast %153 : vector<16xf32> to vector<16x1xf32>
    %cst_68 = arith.constant 1.280000e+02 : f32
    %155 = vector.broadcast %cst_68 : f32 to vector<16x1xf32>
    %156 = arith.divf %154, %155 : vector<16x1xf32>
    %157 = vector.broadcast %156 : vector<16x1xf32> to vector<16x128xf32>
    %158 = arith.subf %148, %157 : vector<16x128xf32>
    %159 = arith.mulf %158, %158 : vector<16x128xf32>
    %cst_69 = arith.constant dense<0.000000e+00> : vector<16xf32>
    %160 = vector.multi_reduction <add>, %159, %cst_69 [1] : vector<16x128xf32> to vector<16xf32>
    %161 = vector.shape_cast %160 : vector<16xf32> to vector<16x1xf32>
    %cst_70 = arith.constant 1.280000e+02 : f32
    %162 = vector.broadcast %cst_70 : f32 to vector<16x1xf32>
    %163 = arith.divf %161, %162 : vector<16x1xf32>
    %164 = vector.broadcast %156 : vector<16x1xf32> to vector<16x128xf32>
    %165 = arith.subf %148, %164 : vector<16x128xf32>
    %cst_71 = arith.constant 9.99999997E-7 : f32
    %166 = vector.broadcast %cst_71 : f32 to vector<16x1xf32>
    %167 = arith.addf %163, %166 : vector<16x1xf32>
    %168 = math.rsqrt %167 : vector<16x1xf32>
    %169 = vector.broadcast %168 : vector<16x1xf32> to vector<16x128xf32>
    %170 = arith.mulf %165, %169 : vector<16x128xf32>
    %171 = vector.broadcast %150 : vector<1x128xf32> to vector<16x128xf32>
    %172 = arith.mulf %170, %171 : vector<16x128xf32>
    %173 = vector.broadcast %152 : vector<1x128xf32> to vector<16x128xf32>
    %174 = arith.addf %172, %173 : vector<16x128xf32>
    %175 = arith.truncf %174 : vector<16x128xf32> to vector<16x128xbf16>
    %c0_72 = arith.constant 0 : index
    %c0_73 = arith.constant 0 : index
    %c0_74 = arith.constant 0 : index
    %176 = vector.load %arg10[%c0_72, %c0_73, %c0_74] : memref<1x128x512xbf16, #tpu.memory_space<vmem>>, vector<1x128x512xbf16>
    %177 = vector.shape_cast %176 : vector<1x128x512xbf16> to vector<128x512xbf16>
    %cst_75 = arith.constant dense<0.000000e+00> : vector<16x512xf32>
    %178 = tpu.matmul %175, %177, %cst_75 {dimension_numbers = #tpu.dot_dimension_numbers<[1], [0], [0], [1], [0, 0, 1, 1], [], []>} : vector<16x128xbf16>, vector<128x512xbf16>, vector<16x512xf32> -> vector<16x512xf32>
    %c0_76 = arith.constant 0 : index
    %c0_77 = arith.constant 0 : index
    %c0_78 = arith.constant 0 : index
    %179 = vector.load %arg11[%c0_76, %c0_77, %c0_78] : memref<1x1x512xf32, #tpu.memory_space<vmem>>, vector<1x1x512xf32>
    %180 = vector.shape_cast %179 : vector<1x1x512xf32> to vector<1x512xf32>
    %181 = vector.broadcast %180 : vector<1x512xf32> to vector<16x512xf32>
    %182 = arith.addf %178, %181 : vector<16x512xf32>
    %cst_79 = arith.constant 5.000000e-01 : f32
    %183 = vector.broadcast %cst_79 : f32 to vector<16x512xf32>
    %184 = arith.mulf %183, %182 : vector<16x512xf32>
    %cst_80 = arith.constant 0.707106769 : f32
    %185 = vector.broadcast %cst_80 : f32 to vector<16x512xf32>
    %186 = arith.mulf %182, %185 : vector<16x512xf32>
    %187 = math.absf %186 : vector<16x512xf32>
    %cst_81 = arith.constant 0.327591091 : f32
    %188 = vector.broadcast %cst_81 : f32 to vector<16x512xf32>
    %189 = arith.mulf %188, %187 : vector<16x512xf32>
    %cst_82 = arith.constant 1.000000e+00 : f32
    %190 = vector.broadcast %cst_82 : f32 to vector<16x512xf32>
    %191 = arith.addf %190, %189 : vector<16x512xf32>
    %cst_83 = arith.constant 1.000000e+00 : f32
    %192 = vector.broadcast %cst_83 : f32 to vector<16x512xf32>
    %193 = arith.divf %192, %191 : vector<16x512xf32>
    %cst_84 = arith.constant 1.06140542 : f32
    %194 = vector.broadcast %cst_84 : f32 to vector<16x512xf32>
    %195 = arith.mulf %194, %193 : vector<16x512xf32>
    %cst_85 = arith.constant -1.45315206 : f32
    %196 = vector.broadcast %cst_85 : f32 to vector<16x512xf32>
    %197 = arith.addf %195, %196 : vector<16x512xf32>
    %198 = arith.mulf %197, %193 : vector<16x512xf32>
    %cst_86 = arith.constant 1.42141378 : f32
    %199 = vector.broadcast %cst_86 : f32 to vector<16x512xf32>
    %200 = arith.addf %198, %199 : vector<16x512xf32>
    %201 = arith.mulf %200, %193 : vector<16x512xf32>
    %cst_87 = arith.constant -0.284496725 : f32
    %202 = vector.broadcast %cst_87 : f32 to vector<16x512xf32>
    %203 = arith.addf %201, %202 : vector<16x512xf32>
    %204 = arith.mulf %203, %193 : vector<16x512xf32>
    %cst_88 = arith.constant 0.254829586 : f32
    %205 = vector.broadcast %cst_88 : f32 to vector<16x512xf32>
    %206 = arith.addf %204, %205 : vector<16x512xf32>
    %207 = arith.mulf %206, %193 : vector<16x512xf32>
    %cst_89 = arith.constant 0.000000e+00 : f32
    %208 = vector.broadcast %cst_89 : f32 to vector<16x512xf32>
    %209 = arith.subf %208, %187 : vector<16x512xf32>
    %210 = arith.mulf %209, %187 : vector<16x512xf32>
    %211 = math.exp %210 : vector<16x512xf32>
    %212 = arith.mulf %207, %211 : vector<16x512xf32>
    %cst_90 = arith.constant 1.000000e+00 : f32
    %213 = vector.broadcast %cst_90 : f32 to vector<16x512xf32>
    %214 = arith.subf %213, %212 : vector<16x512xf32>
    %cst_91 = arith.constant 0.000000e+00 : f32
    %215 = vector.broadcast %cst_91 : f32 to vector<16x512xf32>
    %216 = arith.cmpf oge, %186, %215 : vector<16x512xf32>
    %cst_92 = arith.constant 0.000000e+00 : f32
    %217 = vector.broadcast %cst_92 : f32 to vector<16x512xf32>
    %218 = arith.subf %217, %214 : vector<16x512xf32>
    %219 = arith.select %216, %214, %218 : vector<16x512xi1>, vector<16x512xf32>
    %cst_93 = arith.constant 1.000000e+00 : f32
    %220 = vector.broadcast %cst_93 : f32 to vector<16x512xf32>
    %221 = arith.addf %220, %219 : vector<16x512xf32>
    %222 = arith.mulf %184, %221 : vector<16x512xf32>
    %223 = arith.truncf %222 : vector<16x512xf32> to vector<16x512xbf16>
    %c0_94 = arith.constant 0 : index
    %c0_95 = arith.constant 0 : index
    %c0_96 = arith.constant 0 : index
    %224 = vector.load %arg12[%c0_94, %c0_95, %c0_96] : memref<1x512x128xbf16, #tpu.memory_space<vmem>>, vector<1x512x128xbf16>
    %225 = vector.shape_cast %224 : vector<1x512x128xbf16> to vector<512x128xbf16>
    %cst_97 = arith.constant dense<0.000000e+00> : vector<16x128xf32>
    %226 = tpu.matmul %223, %225, %cst_97 {dimension_numbers = #tpu.dot_dimension_numbers<[1], [0], [0], [1], [0, 0, 1, 1], [], []>} : vector<16x512xbf16>, vector<512x128xbf16>, vector<16x128xf32> -> vector<16x128xf32>
    %c0_98 = arith.constant 0 : index
    %c0_99 = arith.constant 0 : index
    %c0_100 = arith.constant 0 : index
    %227 = vector.load %arg13[%c0_98, %c0_99, %c0_100] : memref<1x1x128xf32, #tpu.memory_space<vmem>>, vector<1x1x128xf32>
    %228 = vector.shape_cast %227 : vector<1x1x128xf32> to vector<1x128xf32>
    %229 = vector.broadcast %228 : vector<1x128xf32> to vector<16x128xf32>
    %230 = arith.addf %226, %229 : vector<16x128xf32>
    %231 = arith.addf %148, %230 : vector<16x128xf32>
    %c0_101 = arith.constant 0 : index
    %c0_102 = arith.constant 0 : index
    %232 = vector.load %arg14[%c0_101, %c0_102] : memref<16x128xf32, #tpu.memory_space<vmem>>, vector<16x128xf32>
    tpu.vector_store %arg14[%c0_101, %c0_102], %231 {strides = array<i32>} : memref<16x128xf32, #tpu.memory_space<vmem>>, vector<16x128xf32>,
    return
  }
  func.func @transform_0(%arg0: i32) -> (i32, i32) {
    %c0_i32 = arith.constant 0 : i32
    %c0_i32_0 = arith.constant 0 : i32
    %c0_i32_1 = arith.constant 0 : i32
    return %c0_i32, %c0_i32_0 : i32, i32
  }
  func.func @transform_1(%arg0: i32) -> (i32, i32, i32) {
    %c0_i32 = arith.constant 0 : i32
    %c0_i32_0 = arith.constant 0 : i32
    %c0_i32_1 = arith.constant 0 : i32
    return %arg0, %c0_i32, %c0_i32_0 : i32, i32, i32
  }
  func.func @transform_2(%arg0: i32) -> (i32, i32, i32) {
    %c0_i32 = arith.constant 0 : i32
    %c0_i32_0 = arith.constant 0 : i32
    %c0_i32_1 = arith.constant 0 : i32
    return %arg0, %c0_i32, %c0_i32_0 : i32, i32, i32
  }
  func.func @transform_3(%arg0: i32) -> (i32, i32, i32) {
    %c0_i32 = arith.constant 0 : i32
    %c0_i32_0 = arith.constant 0 : i32
    %c0_i32_1 = arith.constant 0 : i32
    return %arg0, %c0_i32, %c0_i32_0 : i32, i32, i32
  }
  func.func @transform_4(%arg0: i32) -> (i32, i32, i32) {
    %c0_i32 = arith.constant 0 : i32
    %c0_i32_0 = arith.constant 0 : i32
    %c0_i32_1 = arith.constant 0 : i32
    return %arg0, %c0_i32, %c0_i32_0 : i32, i32, i32
  }
  func.func @transform_5(%arg0: i32) -> (i32, i32, i32) {
    %c0_i32 = arith.constant 0 : i32
    %c0_i32_0 = arith.constant 0 : i32
    %c0_i32_1 = arith.constant 0 : i32
    return %arg0, %c0_i32, %c0_i32_0 : i32, i32, i32
  }
  func.func @transform_6(%arg0: i32) -> (i32, i32, i32) {
    %c0_i32 = arith.constant 0 : i32
    %c0_i32_0 = arith.constant 0 : i32
    %c0_i32_1 = arith.constant 0 : i32
    return %arg0, %c0_i32, %c0_i32_0 : i32, i32, i32
  }
  func.func @transform_7(%arg0: i32) -> (i32, i32, i32) {
    %c0_i32 = arith.constant 0 : i32
    %c0_i32_0 = arith.constant 0 : i32
    %c0_i32_1 = arith.constant 0 : i32
    return %arg0, %c0_i32, %c0_i32_0 : i32, i32, i32
  }
  func.func @transform_8(%arg0: i32) -> (i32, i32, i32) {
    %c0_i32 = arith.constant 0 : i32
    %c0_i32_0 = arith.constant 0 : i32
    %c0_i32_1 = arith.constant 0 : i32
    return %arg0, %c0_i32, %c0_i32_0 : i32, i32, i32
  }
  func.func @transform_9(%arg0: i32) -> (i32, i32, i32) {
    %c0_i32 = arith.constant 0 : i32
    %c0_i32_0 = arith.constant 0 : i32
    %c0_i32_1 = arith.constant 0 : i32
    return %arg0, %c0_i32, %c0_i32_0 : i32, i32, i32
  }
  func.func @transform_10(%arg0: i32) -> (i32, i32, i32) {
    %c0_i32 = arith.constant 0 : i32
    %c0_i32_0 = arith.constant 0 : i32
    %c0_i32_1 = arith.constant 0 : i32
    return %arg0, %c0_i32, %c0_i32_0 : i32, i32, i32
  }
  func.func @transform_11(%arg0: i32) -> (i32, i32, i32) {
    %c0_i32 = arith.constant 0 : i32
    %c0_i32_0 = arith.constant 0 : i32
    %c0_i32_1 = arith.constant 0 : i32
    return %arg0, %c0_i32, %c0_i32_0 : i32, i32, i32
  }
  func.func @transform_12(%arg0: i32) -> (i32, i32, i32) {
    %c0_i32 = arith.constant 0 : i32
    %c0_i32_0 = arith.constant 0 : i32
    %c0_i32_1 = arith.constant 0 : i32
    return %arg0, %c0_i32, %c0_i32_0 : i32, i32, i32
  }
  func.func @transform_13(%arg0: i32) -> (i32, i32) {
    %c0_i32 = arith.constant 0 : i32
    %c0_i32_0 = arith.constant 0 : i32
    %c0_i32_1 = arith.constant 0 : i32
    return %c0_i32, %c0_i32_0 : i32, i32
  }
}

</mosaic_0001>

<bundles_post_ra>
// kernel: open_clip_vision_tower_forward.2
= control target key start
LH: loop header
LB: loop body
LE: loop exit
PB: predicated region body
PF: predicated region fallthrough
CT: control target
= control target key end

     0   :  { %vm47_vm0 = vcmask 523264   ;;  %vm107_vm1 = vcmask 1040384   ;;  %vm113_vm2 = vcmask 1041408   ;;  %vm109_vm3 = vcmask 1044480   ;;  %s238_s1 = inlined_call_operand.vmem [shape: f32[192,128], index: 1, kind: input, shape index: {}]   ;;  %s239_s2 = inlined_call_operand.vmem [shape: f32[1,128], index: 2, kind: input, shape index: {}]   ;;  %s240_s0 = inlined_call_operand.vmem [shape: f32[8,192], index: 0, kind: input, shape index: {}]   ;;  %s241_s3 = inlined_call_operand.vmem [shape: f32[5,128], index: 3, kind: input, shape index: {}]   ;;  %s242_s4 = inlined_call_operand.vmem [shape: f32[16,128], index: 4, kind: output, shape index: {}]  }
   0x1   :  { %v34_v0 = vld [vmem:[%s238_s1 + $0x78] sm:$0xff]  ;;  %v33_v1 = vld [vmem:[%s238_s1 + $0x70] sm:$0xff]  ;;  %v32_v2 = vld [vmem:[%s238_s1 + $0x68] sm:$0xff]  ;;  %vm111_vm4 = vcmask 1045504  }
   0x2   :  { %51 = vmatpush.msra.mxu0 %v34_v0  ;;  %v42_v3 = vld [vmem:[%s238_s1 + $0xb8] sm:$0xff]  ;;  %v31_v4 = vld [vmem:[%s238_s1 + $0x60] sm:$0xff]  ;;  %v41_v5 = vld [vmem:[%s238_s1 + $0xb0] sm:$0xff] }
   0x3   :  { %79 = vmatpush.msra.mxu1 %v42_v3  ;;  %v40_v6 = vld [vmem:[%s238_s1 + $0xa8] sm:$0xff]  ;;  %v30_v7 = vld [vmem:[%s238_s1 + $0x58] sm:$0xff]  ;;  %v39_v8 = vld [vmem:[%s238_s1 + $0xa0] sm:$0xff] }
   0x4   :  { %52 = vmatpush.msra.mxu0 %v33_v1  ;;  %v29_v9 = vld [vmem:[%s238_s1 + $0x50] sm:$0xff]  ;;  %v38_v10 = vld [vmem:[%s238_s1 + $0x98] sm:$0xff]  ;;  %v28_v11 = vld [vmem:[%s238_s1 + $0x48] sm:$0xff] }
   0x5   :  { %80 = vmatpush.msra.mxu1 %v41_v5  ;;  %v37_v12 = vld [vmem:[%s238_s1 + $0x90] sm:$0xff]  ;;  %v27_v13 = vld [vmem:[%s238_s1 + $0x40] sm:$0xff]  ;;  %v36_v14 = vld [vmem:[%s238_s1 + $0x88] sm:$0xff] }
   0x6   :  { %53 = vmatpush.msra.mxu0 %v32_v2  ;;  %v26_v15 = vld [vmem:[%s238_s1 + $0x38] sm:$0xff]  ;;  %v35_v16 = vld [vmem:[%s238_s1 + $0x80] sm:$0xff]  ;;  %v25_v17 = vld [vmem:[%s238_s1 + $0x30] sm:$0xff] }
   0x7   :  { %81 = vmatpush.msra.mxu1 %v40_v6  ;;  %v18_v18 = vld [vmem:[%s240_s0 + $0x8] sm:$0xff]  ;;  %v23_v20 = vld [vmem:[%s238_s1 + $0x20] sm:$0xff]  ;;  %v22_v21 = vld [vmem:[%s238_s1 + $0x18] sm:$0xff] }
   0x8   :  { %54 = vmatpush.msra.mxu0 %v31_v4  ;;  %v24_v19 = vld [vmem:[%s238_s1 + $0x28] sm:$0xff]  ;;  %v21_v22 = vld [vmem:[%s238_s1 + $0x10] sm:$0xff]  ;;  %v19_v24 = vld [vmem:[%s238_s1] sm:$0xff] }
   0x9   :  { %82 = vmatpush.msra.mxu1 %v39_v8  ;;  %v20_v23 = vld [vmem:[%s238_s1 + $0x8] sm:$0xff]  ;;  %v17_v25 = vld [vmem:[%s240_s0] sm:$0xff] }
   0xa   :  { %55 = vmatpush.msra.mxu0 %v30_v7  ;;  %v122_v26 = vld [vmem:[%s239_s2] ss:$0 sm:$0xff] }
   0xb   :  { %83 = vmatpush.msra.mxu1 %v38_v10  ;;  %v91_v27 = vld [vmem:[%s241_s3] sm:$0x1f] }
   0xc   :  { %56 = vmatpush.msra.mxu0 %v29_v9  ;;  %v93_v31 = vrot.slane %v91_v27, 1  ;;  %v96_v32 = vrot.slane %v91_v27, 5  ;;  %v102_v36 = vrot.slane %v91_v27, 3 }
   0xd   :  { %84 = vmatpush.msra.mxu1 %v37_v12 }
   0xe   :  { %57 = vmatpush.msra.mxu0 %v28_v11 }
   0xf   :  { %85 = vmatpush.msra.mxu1 %v36_v14 }
  0x10   :  { %58 = vmatpush.msra.mxu0 %v27_v13 }
  0x11   :  { %86 = vmatpush.msra.mxu1 %v35_v16 }
  0x12   :  { %59 = vmatpush.msra.mxu0 %v26_v15  ;;  %121 = vmatmul.msk.f32.vlgmr.msra.gmra.mxu1 %vm47_vm0, %v18_v18 }
  0x14   :  { %60 = vmatpush.msra.mxu0 %v25_v17 }
  0x16   :  { %61 = vmatpush.msra.mxu0 %v24_v19 }
  0x18   :  { %62 = vmatpush.msra.mxu0 %v23_v20 }
  0x1a   :  { %63 = vmatpush.msra.mxu0 %v22_v21 }
  0x1c   :  { %64 = vmatpush.msra.mxu0 %v21_v22 }
  0x1e   :  { %65 = vmatpush.msra.mxu0 %v20_v23 }
  0x20   :  { %66 = vmatpush.msra.mxu0 %v19_v24 }
  0x21   :  { %67 = vmatmul.f32.vlgmr.msra.gmra.mxu0 %v17_v25 }
  0x8f   :  { %v88_v29 = vpop.f32.mrf.mxu1 }
  0x9e   :  { %v68_v28 = vpop.f32.mrf.mxu0 }
  0x9f   :  { %v69_v30 = vadd.f32 %v122_v26, %v68_v28 }
  0xa1   :  { %v89_v33 = vadd.f32 %v88_v29, %v69_v30 }
  0xa3   :  { %v95_v34 = vadd.f32 %v93_v31, %v89_v33  ;;  %v98_v35 = vadd.f32 %v96_v32, %v89_v33 }
  0xa5   :  { %v100_v37 = vrot.slane %v95_v34, 7  ;;  %v105_v38 = vrot.slane %v98_v35, 6 }
  0xa7   :  { %v108_v39 = vsel %vm107_vm1, %v91_v27, %v100_v37  ;;  %v114_v40 = vsel %vm113_vm2, %v105_v38, 0.0 }
  0xa8   :  { %v110_v41 = vsel %vm109_vm3, %v108_v39, %v102_v36  ;;  %116 = vst [vmem:[%s242_s4 + $0x8] sm:$0xff] %v114_v40 }
  0xa9   :  { %v112_v42 = vsel %vm111_vm4, %v110_v41, %v105_v38 }
  0xaa   :  { %115 = vst [vmem:[%s242_s4] sm:$0xff] %v112_v42 }

// kernel: open_clip_vision_tower_forward.3
= control target key start
LH: loop header
LB: loop body
LE: loop exit
PB: predicated region body
PF: predicated region fallthrough
CT: control target
= control target key end

     0   :  { %s3228_s25 = smov 0   ;;  %s3936_s0 = inlined_call_operand.vmem [shape: f32[16,128], index: 0, kind: input, shape index: {}]   ;;  %s3937_s1 = inlined_call_operand.vmem [shape: f32[2,1,128], index: 1, kind: input, shape index: {}]   ;;  %s3938_s2 = inlined_call_operand.vmem [shape: f32[2,1,128], index: 2, kind: input, shape index: {}]   ;;  %s3939_s3 = inlined_call_operand.vmem [shape: bf16[2,128,384], index: 3, kind: input, shape index: {}]   ;;  %s3940_s4 = inlined_call_operand.vmem [shape: f32[2,1,384], index: 4, kind: input, shape index: {}]   ;;  %s3941_s5 = inlined_call_operand.vmem [shape: bf16[2,128,128], index: 5, kind: input, shape index: {}]   ;;  %s3942_s6 = inlined_call_operand.vmem [shape: f32[2,1,128], index: 6, kind: input, shape index: {}]   ;;  %s3943_s7 = inlined_call_operand.vmem [shape: f32[2,1,128], index: 7, kind: input, shape index: {}]   ;;  %s3944_s8 = inlined_call_operand.vmem [shape: f32[2,1,128], index: 8, kind: input, shape index: {}]   ;;  %s3945_s9 = inlined_call_operand.vmem [shape: bf16[2,128,512], index: 9, kind: input, shape index: {}]   ;;  %s3946_s10 = inlined_call_operand.vmem [shape: f32[2,1,512], index: 10, kind: input, shape index: {}]   ;;  %s3947_s11 = inlined_call_operand.vmem [shape: bf16[2,512,128], index: 11, kind: input, shape index: {}]   ;;  %s3948_s12 = inlined_call_operand.vmem [shape: f32[2,1,128], index: 12, kind: input, shape index: {}]   ;;  %s3949_s13 = inlined_call_operand.vmem [shape: f32[16,128], index: 13, kind: output, shape index: {}]  }
   0x1   :  { %3951 = sst [smem:[#allocation4_spill]] %s3937_s1 }
   0x2   :  { %3952 = sst [smem:[#allocation5_spill]] %s3938_s2 }
   0x3   :  { %3953 = sst [smem:[#allocation6_spill]] %s3939_s3 }
   0x4   :  { %3954 = sst [smem:[#allocation7_spill]] %s3941_s5 }
   0x5 LB: > { %3955 = sst [smem:[#allocation3_spill]] %s3151_s25  ;;  %s2513_s26 = sadd.s32 4294967295, %s3151_s25   ;;  %s3151_s25 = sphi %s3228_s25, %s23_s25  }
   0x6   : > { %p2516_p0 = scmp.ge.s32.totalorder %s3151_s25, 1  ;;  %p478_p1 = scmp.lt.s32.totalorder %s3151_s25, 3 }
   0x8   : > { %p479_p2 = pnand %p2516_p0, %p478_p1 }
   0x9   : > { %p558_p3 = scmp.lt.s32.totalorder (!%p479_p2), %s2513_s26, 1  ;;  %s3958_s5 = sld [smem:[#allocation7_spill]] (!%p479_p2) }
   0xa   : > { %482 = sbr.rel (%p479_p2) target bundleno = 2335 (0x91f), region = 72  ;;  %s3959_s3 = sld [smem:[#allocation6_spill]] (!%p479_p2) }
   0xb   : > { %p2525_p4 = scmp.ne.s32.totalorder (!%p479_p2), %s2513_s26, 0 }
   0xf   : > { %s3236_s27 = scalar_select %p558_p3, %s2513_s26, 1 }
  0x11   : > { %s3035_s17 = smul.u32 192, %s3236_s27  ;;  %s2936_s18 = sshll.u32 %s3236_s27, 6 }
  0x12   : > { %s3036_s19 = smul.u32 3, %s3236_s27  ;;  %s3252_s22 = scalar_lea.vmem %s3958_s5, %s2936_s18 }
  0x13   : > { %s3257_s28 = scalar_lea.vmem %s3959_s3, %s3035_s17  ;;  %s2937_s23 = sshll.u32 %s3236_s27, 8 }
  0x14   : > { %s3266_s16 = scalar_lea.vmem %s3940_s4, %s3036_s19  ;;  %s3280_s3 = scalar_lea.vmem %s3945_s9, %s2937_s23 }
  0x15   : > { %s2522_s30 = sshll.u32 %s3236_s27, 2  ;;  %s3291_s1 = scalar_lea.vmem %s3947_s11, %s2937_s23 }
  0x16   : > { %s3286_s19 = scalar_lea.vmem %s3946_s10, %s2522_s30  ;;  %s603_s21 = scalar_lea.vmem %s3948_s12, %s3236_s27 }
  0x17   : > { %607 = sbr.rel (%p2525_p4) target bundleno = 31 (0x1f), region = 76 }
  0x1c   : > { %v608_v0 = vld [vmem:[%s3936_s0] sm:$0xff]  ;;  %v609_v1 = vld [vmem:[%s3936_s0 + $0x8] sm:$0xff] }
  0x1d   : > { %610 = vst [vmem:[%s3949_s13] sm:$0xff] %v608_v0 }
  0x1e   : > { %611 = vst [vmem:[%s3949_s13 + $0x8] sm:$0xff] %v609_v1 }
  0x1f PF: > { %v3153_v4 = vmov 128.0   ;;  %v2612_v19 = vld [vmem:[%s3257_s28 + $0xa8] sm:$0xf]  ;;  %v2961_v20 = vld [vmem:[%s3257_s28 + $0xb0] sm:$0xf0]  ;;  %s3960_s20 = sld [smem:[#allocation4_spill]]  ;;  %s3964_s26 = scalar_lea.vmem %s3942_s6, %s3236_s27 }
  0x20   : > { %3071 = vrcp.f32 %v3153_v4  ;;  %v2960_v21 = vld [vmem:[%s3257_s28 + $0xac] sm:$0xf]  ;;  %v2613_v22 = vor.u32 %v2961_v20, %v2612_v19  ;;  %v2614_v23 = vld [vmem:[%s3257_s28 + $0xb4] sm:$0xf0]  ;;  %v2620_v24 = vld [vmem:[%s3257_s28 + $0xb0] sm:$0xf]  ;;  %s3965_s2 = scalar_lea.vmem %s3943_s7, %s3236_s27 }
  0x21   : > { %v2962_v25 = vld [vmem:[%s3257_s28 + $0xb8] sm:$0xf0]  ;;  %v2617_v26 = vor.u32 %v2960_v21, %v2614_v23  ;;  %v2600_v28 = vld [vmem:[%s3257_s28 + $0x90] sm:$0xf]  ;;  %v2957_v30 = vld [vmem:[%s3257_s28 + $0x94] sm:$0xf] }
  0x22   : > { %v2621_v27 = vor.u32 %v2962_v25, %v2620_v24  ;;  %864 = vmatpush.bf16.msra.mxu0 %v2613_v22  ;;  %v2958_v29 = vld [vmem:[%s3257_s28 + $0x98] sm:$0xf0]  ;;  %v2602_v32 = vld [vmem:[%s3257_s28 + $0x9c] sm:$0xf0]  ;;  %v2608_v33 = vld [vmem:[%s3257_s28 + $0x98] sm:$0xf] }
  0x23   : > { %878 = vmatpush.bf16.msra.mxu1 %v2617_v26  ;;  %v2601_v31 = vor.u32 %v2958_v29, %v2600_v28  ;;  %v2959_v34 = vld [vmem:[%s3257_s28 + $0xa0] sm:$0xf0]  ;;  %v2605_v35 = vor.u32 %v2957_v30, %v2602_v32  ;;  %v2588_v37 = vld [vmem:[%s3257_s28 + $0x78] sm:$0xf]  ;;  %v2954_v39 = vld [vmem:[%s3257_s28 + $0x7c] sm:$0xf] }
  0x24   : > { %v3312_v2 = vld [vmem:[%s3949_s13] sm:$0xff]  ;;  %892 = vmatpush.bf16.msra.mxu2 %v2621_v27  ;;  %v2609_v36 = vor.u32 %v2959_v34, %v2608_v33  ;;  %v2590_v41 = vld [vmem:[%s3257_s28 + $0x84] sm:$0xf0]  ;;  %v2956_v43 = vld [vmem:[%s3257_s28 + $0x88] sm:$0xf0]  ;;  %s3962_s25 = sld [smem:[#allocation5_spill]] }
  0x25   : > { %638 = vadd.xlane.f32.xlu0 %v3312_v2  ;;  %v3318_v3 = vld [vmem:[%s3949_s13 + $0x8] sm:$0xff]  ;;  %v2955_v38 = vld [vmem:[%s3257_s28 + $0x80] sm:$0xf0]  ;;  %v2596_v42 = vld [vmem:[%s3257_s28 + $0x80] sm:$0xf]  ;;  %v2593_v44 = vor.u32 %v2954_v39, %v2590_v41  ;;  %s3961_s18 = scalar_lea.vmem %s3960_s20, %s3236_s27  ;;  %s3154_s23 = smov 96  }
  0x26   : > { %v3072_v5 = vpop.eup %3071  ;;  %865 = vmatpush.bf16.msra.mxu0 %v2601_v31  ;;  %v2589_v40 = vor.u32 %v2955_v38, %v2588_v37  ;;  %v2597_v45 = vor.u32 %v2956_v43, %v2596_v42  ;;  %v2576_v46 = vld [vmem:[%s3257_s28 + $0x60] sm:$0xf]  ;;  %v2952_v47 = vld [vmem:[%s3257_s28 + $0x68] sm:$0xf0]  ;;  %v2951_v48 = vld [vmem:[%s3257_s28 + $0x64] sm:$0xf]  ;;  %s3966_s20 = scalar_lea.vmem %s3944_s8, %s3236_s27 }
  0x27   : > { %v643_v6 = vmul.f32 128.0, %v3072_v5  ;;  %vm647_vm0 = vweird.f32 %v3072_v5  ;;  %879 = vmatpush.bf16.msra.mxu1 %v2605_v35  ;;  %v2577_v49 = vor.u32 %v2952_v47, %v2576_v46  ;;  %v2578_v50 = vld [vmem:[%s3257_s28 + $0x6c] sm:$0xf0]  ;;  %v2584_v51 = vld [vmem:[%s3257_s28 + $0x68] sm:$0xf]  ;;  %vm908_vm7 = vcmask 261120  }
  0x28   : > { %893 = vmatpush.bf16.msra.mxu2 %v2609_v36  ;;  %v2953_v52 = vld [vmem:[%s3257_s28 + $0x70] sm:$0xf0]  ;;  %v2581_v53 = vor.u32 %v2951_v48, %v2578_v50  ;;  %v2564_v55 = vld [vmem:[%s3257_s28 + $0x48] sm:$0xf]  ;;  %v2948_v57 = vld [vmem:[%s3257_s28 + $0x4c] sm:$0xf] }
  0x29   : > { %v644_v7 = vsub.f32 1.0, %v643_v6  ;;  %v2585_v54 = vor.u32 %v2953_v52, %v2584_v51  ;;  %v2949_v56 = vld [vmem:[%s3257_s28 + $0x50] sm:$0xf0]  ;;  %v2566_v59 = vld [vmem:[%s3257_s28 + $0x54] sm:$0xf0]  ;;  %vm946_vm13 = vcmask 130048  }
  0x2a   : > { %866 = vmatpush.bf16.msra.mxu0 %v2589_v40  ;;  %v2565_v58 = vor.u32 %v2949_v56, %v2564_v55  ;;  %v2572_v60 = vld [vmem:[%s3257_s28 + $0x50] sm:$0xf]  ;;  %v2950_v61 = vld [vmem:[%s3257_s28 + $0x58] sm:$0xf0]  ;;  %v2569_v62 = vor.u32 %v2948_v57, %v2566_v59  ;;  %v2945_v4 = vld [vmem:[%s3257_s28 + $0x34] sm:$0xf]  ;;  %s3963_s30 = scalar_lea.vmem %s3962_s25, %s3236_s27 }
  0x2b   : > { %v645_v8 = vmul.f32 %v3072_v5, %v644_v7  ;;  %880 = vmatpush.bf16.msra.mxu1 %v2593_v44  ;;  %v2573_v63 = vor.u32 %v2950_v61, %v2572_v60  ;;  %v2552_v0 = vld [vmem:[%s3257_s28 + $0x30] sm:$0xf]  ;;  %v2946_v1 = vld [vmem:[%s3257_s28 + $0x38] sm:$0xf0]  ;;  %v2554_v6 = vld [vmem:[%s3257_s28 + $0x3c] sm:$0xf0] }
  0x2c   : > { %894 = vmatpush.bf16.msra.mxu2 %v2597_v45  ;;  %v2560_v7 = vld [vmem:[%s3257_s28 + $0x38] sm:$0xf]  ;;  %v2548_v19 = vld [vmem:[%s3257_s28 + $0x20] sm:$0xf]  ;;  %v2944_v20 = vld [vmem:[%s3257_s28 + $0x28] sm:$0xf0] }
  0x2d   : > { %640 = vadd.xlane.f32.xlu0 %v3318_v3  ;;  %v646_v9 = vadd.f32 %v3072_v5, %v645_v8  ;;  %v2947_v8 = vld [vmem:[%s3257_s28 + $0x40] sm:$0xf0]  ;;  %v2549_v22 = vor.u32 %v2944_v20, %v2548_v19  ;;  %v2528_v23 = vld [vmem:[%s3257_s28] sm:$0xf]  ;;  %v2940_v24 = vld [vmem:[%s3257_s28 + $0x8] sm:$0xf0]  ;;  %v614_v19 = vlaneseq }
  0x2e   : > { %867 = vmatpush.bf16.msra.mxu0 %v2577_v49  ;;  %v2939_v25 = vld [vmem:[%s3257_s28 + $0x4] sm:$0xf]  ;;  %v2529_v27 = vor.u32 %v2940_v24, %v2528_v23  ;;  %v2530_v28 = vld [vmem:[%s3257_s28 + $0xc] sm:$0xf0]  ;;  %v2536_v29 = vld [vmem:[%s3257_s28 + $0x8] sm:$0xf] }
  0x2f   : > { %v3321_v10 = vsel %vm647_vm0, %v3072_v5, %v646_v9  ;;  %881 = vmatpush.bf16.msra.mxu1 %v2581_v53  ;;  %v2553_v5 = vor.u32 %v2946_v1, %v2552_v0  ;;  %v2557_v9 = vor.u32 %v2945_v4, %v2554_v6  ;;  %v2941_v30 = vld [vmem:[%s3257_s28 + $0x10] sm:$0xf0]  ;;  %v2533_v32 = vor.u32 %v2939_v25, %v2530_v28  ;;  %v3065_v51 = vld [vmem:[%s3961_s18] ss:$0 sm:$0xff]  ;;  %s3157_s29 = smov 32  }
  0x30   : > { %895 = vmatpush.bf16.msra.mxu2 %v2585_v54  ;;  %v2537_v33 = vor.u32 %v2941_v30, %v2536_v29  ;;  %v3066_v56 = vld [vmem:[%s3963_s30] ss:$0 sm:$0xff]  ;;  %v618_v20 = vand.u32 127, %v614_v19  ;;  %vm1108_vm15 = vcmask 523520   ;;  %vm1217_vm0 = vcmask 785920  }
  0x31   : > { %v728_v60 = vld [vmem:[%s3266_s16] sm:$0x7]  ;;  %s3155_s16 = smov 64  }
  0x32   : > { %868 = vmatpush.bf16.msra.mxu0 %v2565_v58  ;;  %v730_v61 = vperm.slane %v728_v60, 0  ;;  %vm623_vm8 = vcmp.ge.s32.totalorder %v618_v20, 5  ;;  %vm631_vm9 = vcmp.ge.s32.totalorder %v618_v20, 10 }
  0x33   : > { %882 = vmatpush.bf16.msra.mxu1 %v2569_v62  ;;  %v731_v62 = vperm.slane %v728_v60, 1 }
  0x34   : > { %896 = vmatpush.bf16.msra.mxu2 %v2573_v63 }
  0x36   : > { %869 = vmatpush.bf16.msra.mxu0 %v2553_v5 }
  0x37   : > { %883 = vmatpush.bf16.msra.mxu1 %v2557_v9 }
  0x98   : > { %v639_v11 = vpop.xlane.xlu0 %638 }
  0x99   : > { %v649_v12 = vmul.f32 %v3321_v10, %v639_v11  ;;  %v2561_v11 = vor.u32 %v2947_v8, %v2560_v7  ;;  %v732_v8 = vperm.slane %v728_v60, 2 }
  0x9b   : > { %v3325_v13 = vsub.f32 %v3312_v2, %v649_v12  ;;  %897 = vmatpush.bf16.msra.mxu2 %v2561_v11  ;;  %v2540_v12 = vld [vmem:[%s3257_s28 + $0x18] sm:$0xf] }
  0x9d   : > { %v653_v14 = vmul.f32 %v3325_v13, %v3325_v13 }
  0x9f   : > { %655 = vadd.xlane.f32.xlu1 %v653_v14  ;;  %v2943_v14 = vld [vmem:[%s3257_s28 + $0x20] sm:$0xf0]  ;;  %898 = vmatpush.bf16.msra.mxu2 %v2549_v22  ;;  %v3156_v22 = vmov 0  }
  0xa0   : > { %v641_v15 = vpop.xlane.xlu0 %640  ;;  %v624_v23 = vsel %vm623_vm8, 1, %v3156_v22  ;;  %v632_v24 = vsel %vm631_vm9, 1, %v3156_v22 }
  0xa1   : > { %v650_v16 = vmul.f32 %v3321_v10, %v641_v15  ;;  %v2942_v15 = vld [vmem:[%s3257_s28 + $0x1c] sm:$0xf] }
  0xa3   : > { %v3331_v17 = vsub.f32 %v3318_v3, %v650_v16  ;;  %v2541_v16 = vor.u32 %v2943_v14, %v2540_v12  ;;  %899 = vmatpush.bf16.msra.mxu2 %v2537_v33 }
  0xa5   : > { %v654_v18 = vmul.f32 %v3331_v17, %v3331_v17  ;;  %870 = vmatpush.bf16.msra.mxu0 %v2541_v16 }
  0xa7   : > { %657 = vadd.xlane.f32.xlu1 %v654_v18  ;;  %v2542_v18 = vld [vmem:[%s3257_s28 + $0x24] sm:$0xf0] }
  0xa8   : > { %v2545_v21 = vor.u32 %v2942_v15, %v2542_v18 }
  0xa9   : > { %871 = vmatpush.bf16.msra.mxu0 %v2529_v27 }
  0xaa   : > { %884 = vmatpush.bf16.msra.mxu1 %v2545_v21  ;;  %v615_v21 = vshrl.u32 %v614_v19, 7 }
  0xac   : > { %vm619_vm10 = vcmp.ge.s32.totalorder %v615_v21, 5  ;;  %v616_v25 = vadd.s32 8, %v615_v21 }
  0xad   : > { %v3418_v27 = vsel %vm619_vm10, 1, %v3156_v22 }
  0xae   : > { %885 = vmatpush.bf16.msra.mxu1 %v2533_v32  ;;  %vm626_vm11 = vcmp.ge.s32.totalorder %v616_v25, 10 }
  0xaf   : > { %v628_v28 = vsel %vm626_vm11, 1, %v3156_v22 }
  0xb0   : > { %v3426_v32 = vadd.s32 1, %v628_v28 }
 0x112   : > { %v656_v26 = vpop.xlane.xlu1 %655 }
 0x113   : > { %v659_v31 = vmul.f32 %v656_v26, %v3321_v10  ;;  %v3416_v26 = vadd.s32 %v632_v24, %v624_v23 }
 0x115   : > { %v661_v34 = vadd.f32 1e-06, %v659_v31  ;;  %vm634_vm12 = vcmp.eq.s32.totalorder %v3418_v27, %v3416_v26  ;;  %vm635_vm14 = vcmp.eq.s32.totalorder %v3426_v32, %v3416_v26 }
 0x117   : > { %3073 = vrsqrt.f32 %v661_v34  ;;  %vm669_vm2 = vweird.f32 %v661_v34 }
 0x11a   : > { %v658_v35 = vpop.xlane.xlu1 %657 }
 0x11b   : > { %v660_v36 = vmul.f32 %v658_v35, %v3321_v10 }
 0x11d   : > { %v3074_v37 = vpop.eup %3073  ;;  %v662_v38 = vadd.f32 1e-06, %v660_v36 }
 0x11e   : > { %v664_v39 = vmul.f32 %v3074_v37, %v661_v34  ;;  %vm670_vm1 = vweird.f32 %v3074_v37 }
 0x11f   : > { %3075 = vrsqrt.f32 %v662_v38  ;;  %vm671_vm3 = vmor %vm669_vm2, %vm670_vm1  ;;  %vm679_vm5 = vweird.f32 %v662_v38  ;;  %vm1326_vm1 = vcmask 1048320  }
 0x120   : > { %v665_v40 = vmul.f32 %v3074_v37, %v664_v39 }
 0x122   : > { %v666_v41 = vmul.f32 0.5, %v665_v40 }
 0x124   : > { %v667_v42 = vsub.f32 1.5, %v666_v41 }
 0x125   : > { %v3076_v43 = vpop.eup %3075 }
 0x126   : > { %v668_v44 = vmul.f32 %v3074_v37, %v667_v42  ;;  %v674_v45 = vmul.f32 %v3076_v43, %v662_v38  ;;  %vm680_vm4 = vweird.f32 %v3076_v43 }
 0x127   : > { %vm681_vm6 = vmor %vm679_vm5, %vm680_vm4 }
 0x128   : > { %v675_v46 = vmul.f32 %v3076_v43, %v674_v45  ;;  %v672_v47 = vsel %vm671_vm3, %v3074_v37, %v668_v44 }
 0x129   : > { %v683_v50 = vmul.f32 %v672_v47, %v3325_v13 }
 0x12a   : > { %v676_v48 = vmul.f32 0.5, %v675_v46 }
 0x12b   : > { %v688_v55 = vmul.f32 %v3065_v51, %v683_v50 }
 0x12c   : > { %v677_v49 = vsub.f32 1.5, %v676_v48 }
 0x12d   : > { %v693_v13 = vadd.f32 %v3066_v56, %v688_v55 }
 0x12e   : > { %v678_v52 = vmul.f32 %v3076_v43, %v677_v49 }
 0x130   : > { %v682_v53 = vsel %vm681_vm6, %v3076_v43, %v678_v52 }
 0x131   : > { %v684_v54 = vmul.f32 %v682_v53, %v3331_v17 }
 0x133   : > { %v689_v57 = vmul.f32 %v3065_v51, %v684_v54 }
 0x135   : > { %v694_v58 = vadd.f32 %v3066_v56, %v689_v57 }
 0x137   : > { %v695_v59 = vpack.c.bf16 %v694_v58, %v693_v13 }
 0x139   : > { %872 = vmatmul.bf16.vlgmr.msra.gmra.mxu0 %v695_v59  ;;  %886 = vmatmul.bf16.vlgmr.msra.gmra.mxu1 %v695_v59 }
 0x13a   : > { %900 = vmatmul.bf16.vlgmr.msra.gmra.mxu2 %v695_v59 }
 0x1b6   : > { %v873_v63 = vpop.f32.mrf.mxu0  ;;  %v887_v0 = vpop.f32.mrf.mxu1 }
 0x1b7   : > { %v874_v1 = vadd.f32 %v873_v63, %v730_v61  ;;  %v888_v17 = vadd.f32 %v887_v0, %v731_v62 }
 0x1b9   : > { %v3398_v4 = vmul.f32 0.17677669, %v874_v1  ;;  %1004 = vrot.lane.b32.xlu0 %v888_v17, %s3154_s23 }
 0x1bb   : > { %1000 = vrot.lane.b32.xlu1 %v3398_v4, %s3154_s23 }
 0x1bd   : > { %v901_v5 = vpop.f32.mrf.mxu2 }
 0x1be   : > { %v889_v6 = vpop.f32.mrf.mxu1  ;;  %v902_v11 = vadd.f32 %v901_v5, %v732_v8  ;;  %v875_v14 = vpop.f32.mrf.mxu0 }
 0x1bf   : > { %v3403_v7 = vadd.f32 %v889_v6, %v731_v62  ;;  %v876_v16 = vadd.f32 %v875_v14, %v730_v61 }
 0x1c1   : > { %2622 = vmatpush.xpose.msk.msra.mxu3 %vm908_vm7, %v3403_v7  ;;  %1115 = vrot.lane.b32.xlu0 %v888_v17, %s3155_s16  ;;  %v907_v18 = vmul.f32 0.17677669, %v876_v16 }
 0x1c3   : > { %1111 = vrot.lane.b32.xlu1 %v3398_v4, %s3155_s16 }
 0x1c5   : > { %v903_v9 = vpop.f32.mrf.mxu2  ;;  %2623 = vmatpush.xpose.msk.msra.mxu3 %vm908_vm7, %v888_v17 }
 0x1c6   : > { %v904_v12 = vadd.f32 %v903_v9, %v732_v8 }
 0x1c8   : > { %v3411_v15 = vpack.i.bf16 %v902_v11, %v904_v12  ;;  %2624 = vmatmul.msk.f32.vlgmr.msra.gmra.mxu3 %vm908_vm7, %v3398_v4 }
 0x1c9   : > { %989 = vmatpush.msrb.mxu3 %v904_v12 }
 0x1cb   : > { %990 = vmatpush.msrb.mxu3 %v902_v11 }
 0x1d0   : > { %2625 = vmatmul.msk.f32.gmra.mxu3 %vm908_vm7, %v907_v18 }
 0x22b   : > { %v1005_v45 = vpop.permute.xlu0 %1004 }
 0x22d   : > { %v1001_v48 = vpop.permute.xlu1 %1000 }
 0x233   : > { %v1116_v50 = vpop.permute.xlu0 %1115 }
 0x235   : > { %v1112_v51 = vpop.permute.xlu1 %1111 }
 0x24b   : > { %v938_v29 = vpop.f32.mrf.mxu3 }
 0x24c   : > { %v944_v30 = vsel %vm634_vm12, %v938_v29, -1e+30 }
 0x24d   : > { %v947_v31 = vsel %vm946_vm13, %v944_v30, -inf }
 0x24e   : > { %948 = vmax.xlane.f32.xlu2 %v947_v31 }
 0x253   : > { %v941_v33 = vpop.f32.mrf.mxu3 }
 0x254   : > { %v945_v34 = vsel %vm635_vm14, %v941_v33, -1e+30 }
 0x255   : > { %v950_v35 = vsel %vm946_vm13, %v945_v34, -inf }
 0x256   : > { %951 = vmax.xlane.f32.xlu2 %v950_v35 }
 0x26e   : > { %1006 = vrot.lane.b32.xlu2 %v3403_v7, %s3154_s23 }
 0x276   : > { %1117 = vrot.lane.b32.xlu2 %v3403_v7, %s3155_s16 }
 0x27e   : > { %1002 = vrot.lane.b32.xlu2 %v907_v18, %s3154_s23 }
 0x286   : > { %1224 = vrot.lane.b32.xlu2 %v888_v17, %s3157_s29 }
 0x28e   : > { %1222 = vrot.lane.b32.xlu2 %v907_v18, %s3157_s29 }
 0x2c1   : > { %v949_v36 = vpop.xlane.xlu2 %948 }
 0x2c2   : > { %v953_v37 = vsub.f32 %v944_v30, %v949_v36 }
 0x2c4   : > { %v955_v38 = vmul.f32 1.442695, %v953_v37 }
 0x2c6   : > { %3077 = vpow2.f32 %v955_v38 }
 0x2c9   : > { %v952_v39 = vpop.xlane.xlu2 %951 }
 0x2ca   : > { %v954_v40 = vsub.f32 %v945_v34, %v952_v39 }
 0x2cc   : > { %v3078_v41 = vpop.eup %3077  ;;  %v957_v42 = vmul.f32 1.442695, %v954_v40 }
 0x2cd   : > { %v959_v43 = vsel %vm946_vm13, %v3078_v41, 0.0 }
 0x2ce   : > { %3079 = vpow2.f32 %v957_v42  ;;  %960 = vadd.xlane.f32.xlu0 %v959_v43 }
 0x2d1   : > { %v1007_v44 = vpop.permute.xlu2 %1006 }
 0x2d2   : > { %2628 = vmatpush.xpose.msk.msra.mxu3 %vm908_vm7, %v1007_v44 }
 0x2d4   : > { %v3080_v46 = vpop.eup %3079 }
 0x2d5   : > { %v962_v47 = vsel %vm946_vm13, %v3080_v46, 0.0 }
 0x2d6   : > { %963 = vadd.xlane.f32.xlu1 %v962_v47  ;;  %2629 = vmatpush.xpose.msk.msra.mxu3 %vm908_vm7, %v1005_v45 }
 0x2d9   : > { %v1118_v49 = vpop.permute.xlu2 %1117 }
 0x2da   : > { %2634 = vmatpush.xpose.msk.msrb.mxu2 %vm908_vm7, %v1118_v49 }
 0x2de   : > { %2635 = vmatpush.xpose.msk.msrb.mxu2 %vm908_vm7, %v1116_v50 }
 0x2e1   : > { %2636 = vmatmul.msk.f32.vlgmr.msrb.gmra.mxu2 %vm908_vm7, %v1112_v51  ;;  %v1003_v56 = vpop.permute.xlu2 %1002 }
 0x2e2   : > { %1226 = vrot.lane.b32.xlu0 %v3403_v7, %s3157_s29 }
 0x2e9   : > { %v1225_v59 = vpop.permute.xlu2 %1224 }
 0x2ea   : > { %1113 = vrot.lane.b32.xlu0 %v907_v18, %s3155_s16 }
 0x2ef   : > { %1220 = vrot.lane.b32.xlu1 %v3398_v4, %s3157_s29 }
 0x2f1   : > { %v1223_v1 = vpop.permute.xlu2 %1222 }
 0x341   : > { %v961_v52 = vpop.xlane.xlu0 %960 }
 0x342   : > { %3081 = vrcp.f32 %v961_v52 }
 0x348   : > { %v3082_v53 = vpop.eup %3081 }
 0x349   : > { %v964_v54 = vpop.xlane.xlu1 %963  ;;  %v967_v55 = vmul.f32 %v3082_v53, %v3078_v41 }
 0x34a   : > { %3083 = vrcp.f32 %v964_v54 }
 0x34b   : > { %2626 = vmatmul.msk.f32.vlgmr.msrb.gmra.mxu3 %vm946_vm13, %v967_v55 }
 0x350   : > { %v3084_v57 = vpop.eup %3083 }
 0x351   : > { %v968_v13 = vmul.f32 %v3084_v57, %v3080_v46 }
 0x353   : > { %2627 = vmatmul.msk.f32.gmra.mxu3 %vm946_vm13, %v968_v13 }
 0x354   : > { %v1227_v58 = vpop.permute.xlu0 %1226 }
 0x355   : > { %2640 = vmatpush.xpose.msk.msrb.mxu3 %vm908_vm7, %v1227_v58 }
 0x359   : > { %2641 = vmatpush.xpose.msk.msrb.mxu3 %vm908_vm7, %v1225_v59 }
 0x35b   : > { %2630 = vmatmul.msk.f32.vlgmr.msra.gmra.mxu3 %vm908_vm7, %v1001_v48 }
 0x35c   : > { %v1114_v60 = vpop.permute.xlu0 %1113 }
 0x35d   : > { %2637 = vmatmul.msk.f32.gmra.mxu2 %vm908_vm7, %v1114_v60 }
 0x361   : > { %v1221_v0 = vpop.permute.xlu1 %1220 }
 0x363   : > { %2631 = vmatmul.msk.f32.gmra.mxu3 %vm908_vm7, %v1003_v56 }
 0x364   : > { %v1144_v61 = vpop.f32.mrf.mxu2 }
 0x365   : > { %v1150_v62 = vsel %vm634_vm12, %v1144_v61, -1e+30 }
 0x366   : > { %v1152_v63 = vsel %vm946_vm13, %v1150_v62, -inf }
 0x367   : > { %1153 = vmax.xlane.f32.xlu2 %v1152_v63 }
 0x36b   : > { %2642 = vmatmul.msk.f32.vlgmr.msrb.gmra.mxu3 %vm908_vm7, %v1221_v0 }
 0x373   : > { %2643 = vmatmul.msk.f32.gmra.mxu3 %vm908_vm7, %v1223_v1 }
 0x3ce   : > { %v992_v17 = vpop.f32.mrf.mxu3 }
 0x3cf   : > { %998 = vst.msk [vmem:[#allocation2] sm:$0xff] %vm908_vm7, %v992_v17 }
 0x3d6   : > { %v995_v4 = vpop.f32.mrf.mxu3 }
 0x3d7   : > { %999 = vst.msk [vmem:[#allocation2 + $0x8] sm:$0xff] %vm908_vm7, %v995_v4 }
 0x3da   : > { %v1154_v12 = vpop.xlane.xlu2 %1153 }
 0x3db   : > { %v1158_v16 = vsub.f32 %v1150_v62, %v1154_v12 }
 0x3dd   : > { %v1160_v20 = vmul.f32 1.442695, %v1158_v16 }
 0x3de   : > { %v1033_v5 = vpop.f32.mrf.mxu3 }
 0x3df   : > { %v1039_v6 = vsel %vm634_vm12, %v1033_v5, -1e+30  ;;  %3085 = vpow2.f32 %v1160_v20 }
 0x3e0   : > { %v1147_v7 = vpop.f32.mrf.mxu2  ;;  %v1041_v8 = vsel %vm946_vm13, %v1039_v6, -inf }
 0x3e1   : > { %v1151_v9 = vsel %vm635_vm14, %v1147_v7, -1e+30  ;;  %1042 = vmax.xlane.f32.xlu1 %v1041_v8 }
 0x3e2   : > { %v1155_v11 = vsel %vm946_vm13, %v1151_v9, -inf }
 0x3e3   : > { %1156 = vmax.xlane.f32.xlu0 %v1155_v11 }
 0x3e5   : > { %v3484_v24 = vpop.eup %3085 }
 0x3e6   : > { %v1036_v14 = vpop.f32.mrf.mxu3  ;;  %v1164_v30 = vsel %vm946_vm13, %v3484_v24, 0.0 }
 0x3e7   : > { %v1040_v18 = vsel %vm635_vm14, %v1036_v14, -1e+30 }
 0x3e8   : > { %v1044_v19 = vsel %vm946_vm13, %v1040_v18, -inf }
 0x3eb   : > { %1045 = vmax.xlane.f32.xlu0 %v1044_v19 }
 0x3ee   : > { %v1253_v21 = vpop.f32.mrf.mxu3 }
 0x3ef   : > { %v1259_v22 = vsel %vm634_vm12, %v1253_v21, -1e+30 }
 0x3f0   : > { %v1261_v23 = vsel %vm946_vm13, %v1259_v22, -inf }
 0x3f1   : > { %1262 = vmax.xlane.f32.xlu1 %v1261_v23 }
 0x3f6   : > { %v1256_v25 = vpop.f32.mrf.mxu3 }
 0x3f7   : > { %v1260_v28 = vsel %vm635_vm14, %v1256_v25, -1e+30 }
 0x3f8   : > { %v1264_v29 = vsel %vm946_vm13, %v1260_v28, -inf }
 0x3f9   : > { %1265 = vmax.xlane.f32.xlu2 %v1264_v29  ;;  %1165 = vadd.xlane.f32.xlu1 %v1164_v30  ;;  %v2969_v29 = vld [vmem:[%s3252_s22 + $0x30] sm:$0xff]  ;;  %v2968_v30 = vld [vmem:[%s3252_s22 + $0x28] sm:$0xff] }
 0x3ff   : > { %3051 = vrot.lane.b32.xlu0 %v3411_v15, %s3154_s23 }
 0x454   : > { %v1043_v27 = vpop.xlane.xlu1 %1042 }
 0x455   : > { %v1047_v31 = vsub.f32 %v1039_v6, %v1043_v27  ;;  %v2967_v27 = vld [vmem:[%s3252_s22 + $0x20] sm:$0xff] }
 0x456   : > { %v1157_v33 = vpop.xlane.xlu0 %1156 }
 0x457   : > { %v1049_v34 = vmul.f32 1.442695, %v1047_v31  ;;  %v1159_v35 = vsub.f32 %v1151_v9, %v1157_v33  ;;  %v2966_v31 = vld [vmem:[%s3252_s22 + $0x18] sm:$0xff]  ;;  %v2965_v33 = vld [vmem:[%s3252_s22 + $0x10] sm:$0xff] }
 0x459   : > { %3087 = vpow2.f32 %v1049_v34  ;;  %v1162_v36 = vmul.f32 1.442695, %v1159_v35  ;;  %v2964_v34 = vld [vmem:[%s3252_s22 + $0x8] sm:$0xff]  ;;  %v2963_v35 = vld [vmem:[%s3252_s22] sm:$0xff] }
 0x45b   : > { %3089 = vpow2.f32 %v1162_v36 }
 0x45e   : > { %v1046_v26 = vpop.xlane.xlu0 %1045 }
 0x45f   : > { %v3088_v32 = vpop.eup %3087  ;;  %v1048_v37 = vsub.f32 %v1040_v18, %v1046_v26 }
 0x460   : > { %v1053_v38 = vsel %vm946_vm13, %v3088_v32, 0.0 }
 0x461   : > { %v3090_v39 = vpop.eup %3089  ;;  %v1051_v40 = vmul.f32 1.442695, %v1048_v37  ;;  %1054 = vadd.xlane.f32.xlu1 %v1053_v38 }
 0x462   : > { %v1167_v41 = vsel %vm946_vm13, %v3090_v39, 0.0 }
 0x463   : > { %3091 = vpow2.f32 %v1051_v40  ;;  %1168 = vadd.xlane.f32.xlu0 %v1167_v41 }
 0x464   : > { %v1263_v42 = vpop.xlane.xlu1 %1262 }
 0x465   : > { %v1267_v43 = vsub.f32 %v1259_v22, %v1263_v42 }
 0x467   : > { %v1269_v44 = vmul.f32 1.442695, %v1267_v43  ;;  %v3067_v43 = vld [vmem:[%s3964_s26] ss:$0 sm:$0xff] }
 0x469   : > { %v3092_v45 = vpop.eup %3091  ;;  %3093 = vpow2.f32 %v1269_v44 }
 0x46a   : > { %v1056_v46 = vsel %vm946_vm13, %v3092_v45, 0.0 }
 0x46b   : > { %1057 = vadd.xlane.f32.xlu2 %v1056_v46 }
 0x46c   : > { %v1266_v52 = vpop.xlane.xlu2 %1265  ;;  %v1166_v57 = vpop.xlane.xlu1 %1165 }
 0x46d   : > { %v1268_v53 = vsub.f32 %v1260_v28, %v1266_v52  ;;  %v2970_v28 = vld [vmem:[%s3252_s22 + $0x38] sm:$0xff] }
 0x46e   : > { %1400 = vmatpush.bf16.msrb.mxu1 %v2970_v28 }
 0x46f   : > { %v3094_v47 = vpop.eup %3093  ;;  %v1271_v54 = vmul.f32 1.442695, %v1268_v53 }
 0x470   : > { %v1273_v48 = vsel %vm946_vm13, %v3094_v47, 0.0 }
 0x471   : > { %v3052_v49 = vpop.permute.xlu0 %3051  ;;  %1274 = vadd.xlane.f32.xlu1 %v1273_v48  ;;  %3095 = vpow2.f32 %v1271_v54 }
 0x472   : > { %v3053_v50 = vunpack.i.l.bf16 %v3052_v49  ;;  %v3054_v51 = vunpack.i.h.bf16 %v3052_v49  ;;  %1401 = vmatpush.bf16.msrb.mxu1 %v2969_v29 }
 0x474   : > { %1091 = vmatpush.msrb.mxu0 %v3053_v50 }
 0x476   : > { %1092 = vmatpush.msrb.mxu0 %v3054_v51  ;;  %1402 = vmatpush.bf16.msrb.mxu1 %v2968_v30  ;;  %v2992_v30 = vld [vmem:[%s3280_s3 + $0xac] sm:$0xf] }
 0x477   : > { %v3096_v55 = vpop.eup %3095 }
 0x478   : > { %v1276_v56 = vsel %vm946_vm13, %v3096_v55, 0.0 }
 0x47a   : > { %1403 = vmatpush.bf16.msrb.mxu1 %v2967_v27  ;;  %v2770_v27 = vld [vmem:[%s3280_s3 + $0xb8] sm:$0xf0] }
 0x47e   : > { %1404 = vmatpush.bf16.msrb.mxu1 %v2966_v31  ;;  %v2773_v31 = vor.u32 %v2992_v30, %v2770_v27  ;;  %v2688_v30 = vld [vmem:[%s3280_s3 + $0x8] sm:$0xf]  ;;  %v2974_v27 = vld [vmem:[%s3280_s3 + $0x14] sm:$0xf0] }
 0x482   : > { %1405 = vmatpush.bf16.msrb.mxu1 %v2965_v33  ;;  %v2744_v33 = vld [vmem:[%s3280_s3 + $0x80] sm:$0xf] }
 0x483   : > { %3056 = vrot.lane.b32.xlu2 %v3411_v15, %s3155_s16 }
 0x486   : > { %1406 = vmatpush.bf16.msrb.mxu1 %v2964_v34  ;;  %v2989_v34 = vld [vmem:[%s3280_s3 + $0x8c] sm:$0xf0] }
 0x48a   : > { %3061 = vrot.lane.b32.xlu1 %v3411_v15, %s3157_s29  ;;  %1407 = vmatpush.bf16.msrb.mxu1 %v2963_v35  ;;  %v2987_v35 = vld [vmem:[%s3280_s3 + $0x84] sm:$0xf] }
 0x4ac   : > { %1277 = vadd.xlane.f32.xlu2 %v1276_v56  ;;  %v2792_v56 = vld [vmem:[%s3280_s3 + $0xe0] sm:$0xf] }
 0x4d4   : > { %v1055_v13 = vpop.xlane.xlu1 %1054 }
 0x4d5   : > { %3097 = vrcp.f32 %v1055_v13  ;;  %v2999_v13 = vld [vmem:[%s3280_s3 + $0xe4] sm:$0xf] }
 0x4d6   : > { %v1169_v15 = vpop.xlane.xlu0 %1168 }
 0x4db   : > { %v3098_v58 = vpop.eup %3097 }
 0x4dc   : > { %v1061_v59 = vmul.f32 %v3098_v58, %v3088_v32 }
 0x4de   : > { %2632 = vmatmul.msk.f32.vlgmr.msrb.gmra.mxu0 %vm946_vm13, %v1061_v59  ;;  %v1058_v60 = vpop.xlane.xlu2 %1057  ;;  %v2794_v59 = vld [vmem:[%s3280_s3 + $0xf0] sm:$0xf0] }
 0x4df   : > { %3099 = vrcp.f32 %v1058_v60  ;;  %v2800_v60 = vld [vmem:[%s3280_s3 + $0xe8] sm:$0xf] }
 0x4e0   : > { %3101 = vrcp.f32 %v1166_v57  ;;  %v3001_v57 = vld [vmem:[%s3280_s3 + $0xec] sm:$0xf0] }
 0x4e1   : > { %3103 = vrcp.f32 %v1169_v15  ;;  %v2793_v58 = vor.u32 %v3001_v57, %v2792_v56  ;;  %v2797_v15 = vor.u32 %v2999_v13, %v2794_v59  ;;  %v2712_v57 = vld [vmem:[%s3280_s3 + $0x40] sm:$0xf]  ;;  %v2981_v13 = vld [vmem:[%s3280_s3 + $0x4c] sm:$0xf0] }
 0x4e2   : > { %v2713_v59 = vor.u32 %v2981_v13, %v2712_v57  ;;  %v3069_v57 = vld [vmem:[%s3966_s20] ss:$0 sm:$0xff] }
 0x4e3   : > { %1685 = vmatpush.bf16.msra.mxu3 %v2797_v15  ;;  %v2982_v15 = vld [vmem:[%s3280_s3 + $0x54] sm:$0xf0] }
 0x4e4   : > { %v1275_v7 = vpop.xlane.xlu1 %1274 }
 0x4e5   : > { %v3100_v61 = vpop.eup %3099  ;;  %3105 = vrcp.f32 %v1275_v7  ;;  %v2778_v7 = vld [vmem:[%s3280_s3 + $0xd0] sm:$0xf0] }
 0x4e6   : > { %v3057_v62 = vpop.permute.xlu2 %3056  ;;  %v1062_v63 = vmul.f32 %v3100_v61, %v3092_v45  ;;  %v3102_v0 = vpop.eup %3101  ;;  %v3002_v61 = vld [vmem:[%s3280_s3 + $0xf4] sm:$0xf0] }
 0x4e7   : > { %v3058_v1 = vunpack.i.l.bf16 %v3057_v62  ;;  %v3059_v17 = vunpack.i.h.bf16 %v3057_v62  ;;  %v1172_v4 = vmul.f32 %v3102_v0, %v3484_v24  ;;  %v3104_v5 = vpop.eup %3103  ;;  %v2801_v62 = vor.u32 %v3002_v61, %v2800_v60  ;;  %v2802_v0 = vld [vmem:[%s3280_s3 + $0xf8] sm:$0xf0]  ;;  %v2714_v60 = vld [vmem:[%s3280_s3 + $0x50] sm:$0xf0]  ;;  %v2720_v61 = vld [vmem:[%s3280_s3 + $0x48] sm:$0xf] }
 0x4e8   : > { %2633 = vmatmul.msk.f32.gmra.mxu0 %vm946_vm13, %v1062_v63  ;;  %v1173_v6 = vmul.f32 %v3104_v5, %v3090_v39  ;;  %v3000_v63 = vld [vmem:[%s3280_s3 + $0xec] sm:$0xf]  ;;  %v2995_v5 = vld [vmem:[%s3280_s3 + $0xc4] sm:$0xf] }
 0x4e9   : > { %1200 = vmatpush.msra.mxu2 %v3058_v1  ;;  %v2805_v1 = vor.u32 %v3000_v63, %v2802_v0  ;;  %v2721_v63 = vor.u32 %v2982_v15, %v2720_v61  ;;  %v2980_v0 = vld [vmem:[%s3280_s3 + $0x4c] sm:$0xf] }
 0x4eb   : > { %1201 = vmatpush.msra.mxu2 %v3059_v17  ;;  %v3106_v9 = vpop.eup %3105  ;;  %v2776_v17 = vld [vmem:[%s3280_s3 + $0xc0] sm:$0xf]  ;;  %1713 = vmatpush.bf16.msra.mxu1 %v2805_v1  ;;  %v2722_v1 = vld [vmem:[%s3280_s3 + $0x58] sm:$0xf0] }
 0x4ec   : > { %2638 = vmatmul.msk.f32.vlgmr.msra.gmra.mxu2 %vm946_vm13, %v1172_v4  ;;  %v1281_v14 = vmul.f32 %v3106_v9, %v3094_v47  ;;  %v2997_v4 = vld [vmem:[%s3280_s3 + $0xcc] sm:$0xf0]  ;;  %v2998_v9 = vld [vmem:[%s3280_s3 + $0xd4] sm:$0xf0] }
 0x4ed   : > { %1671 = vmatpush.bf16.msrb.mxu2 %v2793_v58  ;;  %v2979_v58 = vld [vmem:[%s3280_s3 + $0x44] sm:$0xf] }
 0x4f4   : > { %2639 = vmatmul.msk.f32.gmra.mxu2 %vm946_vm13, %v1173_v6  ;;  %v2777_v6 = vor.u32 %v2997_v4, %v2776_v17  ;;  %v2725_v17 = vor.u32 %v2980_v0, %v2722_v1  ;;  %v2696_v4 = vld [vmem:[%s3280_s3 + $0x20] sm:$0xf] }
 0x4f6   : > { %1672 = vmatpush.bf16.msrb.mxu2 %v2777_v6  ;;  %v2975_v6 = vld [vmem:[%s3280_s3 + $0x24] sm:$0xf] }
 0x4fc   : > { %v3062_v8 = vpop.permute.xlu1 %3061 }
 0x4fd   : > { %v3063_v11 = vunpack.i.l.bf16 %v3062_v8  ;;  %v3064_v12 = vunpack.i.h.bf16 %v3062_v8  ;;  %v2784_v8 = vld [vmem:[%s3280_s3 + $0xc8] sm:$0xf] }
 0x4ff   : > { %1309 = vmatpush.msra.mxu0 %v3063_v11  ;;  %v2781_v11 = vor.u32 %v2995_v5, %v2778_v7  ;;  %v2977_v5 = vld [vmem:[%s3280_s3 + $0x2c] sm:$0xf0] }
 0x500   : > { %v2697_v7 = vor.u32 %v2977_v5, %v2696_v4 }
 0x501   : > { %1310 = vmatpush.msra.mxu0 %v3064_v12  ;;  %v2785_v12 = vor.u32 %v2998_v9, %v2784_v8  ;;  %1686 = vmatpush.bf16.msra.mxu3 %v2781_v11  ;;  %v2698_v8 = vld [vmem:[%s3280_s3 + $0x30] sm:$0xf0]  ;;  %v2704_v9 = vld [vmem:[%s3280_s3 + $0x28] sm:$0xf]  ;;  %v2978_v11 = vld [vmem:[%s3280_s3 + $0x34] sm:$0xf0] }
 0x502   : > { %2644 = vmatmul.msk.f32.vlgmr.msra.gmra.mxu0 %vm946_vm13, %v1281_v14  ;;  %v2996_v14 = vld [vmem:[%s3280_s3 + $0xcc] sm:$0xf] }
 0x503   : > { %1699 = vmatpush.bf16.msrb.mxu0 %v2801_v62  ;;  %v2717_v62 = vor.u32 %v2979_v58, %v2714_v60  ;;  %v3628_v60 = vld [vmem:[%s3286_s19] sm:$0xf] }
 0x504   : > { %v1505_v61 = vperm.slane %v3628_v60, 2  ;;  %v1503_v1 = vperm.slane %v3628_v60, 0 }
 0x507   : > { %1700 = vmatpush.bf16.msrb.mxu0 %v2785_v12  ;;  %v2701_v12 = vor.u32 %v2975_v6, %v2698_v8 }
 0x51f   : > { %v1278_v16 = vpop.xlane.xlu2 %1277 }
 0x520   : > { %3107 = vrcp.f32 %v1278_v16  ;;  %v2786_v16 = vld [vmem:[%s3280_s3 + $0xd8] sm:$0xf0] }
 0x526   : > { %v3108_v18 = vpop.eup %3107 }
 0x527   : > { %v1282_v19 = vmul.f32 %v3108_v18, %v3096_v55  ;;  %v2789_v18 = vor.u32 %v2996_v14, %v2786_v16  ;;  %v2705_v14 = vor.u32 %v2978_v11, %v2704_v9  ;;  %v2976_v16 = vld [vmem:[%s3280_s3 + $0x2c] sm:$0xf] }
 0x529   : > { %2645 = vmatmul.msk.f32.gmra.mxu0 %vm946_vm13, %v1282_v19  ;;  %v2760_v19 = vld [vmem:[%s3280_s3 + $0xa0] sm:$0xf]  ;;  %1714 = vmatpush.bf16.msra.mxu1 %v2789_v18  ;;  %v2706_v18 = vld [vmem:[%s3280_s3 + $0x38] sm:$0xf0] }
 0x52d   : > { %1715 = vmatpush.bf16.msra.mxu1 %v2773_v31  ;;  %v2972_v31 = vld [vmem:[%s3280_s3 + $0xc] sm:$0xf] }
 0x55b   : > { %v1094_v22 = vpop.f32.mrf.mxu0 }
 0x565   : > { %v1097_v23 = vpop.f32.mrf.mxu0 }
 0x56f   : > { %v1203_v20 = vpop.f32.mrf.mxu2 }
 0x570   : > { %1211 = vrot.lane.b32.xlu0 %v1203_v20, %s3155_s16  ;;  %v2993_v20 = vld [vmem:[%s3280_s3 + $0xac] sm:$0xf0] }
 0x577   : > { %v1206_v21 = vpop.f32.mrf.mxu2 }
 0x578   : > { %1213 = vrot.lane.b32.xlu1 %v1206_v21, %s3155_s16  ;;  %v2991_v21 = vld [vmem:[%s3280_s3 + $0xa4] sm:$0xf] }
 0x57f   : > { %v1312_v24 = vpop.f32.mrf.mxu0 }
 0x580   : > { %1102 = vrot.lane.b32.xlu1 %v1094_v22, %s3157_s29  ;;  %v2761_v22 = vor.u32 %v2993_v20, %v2760_v19  ;;  %v2680_v19 = vld [vmem:[%s3280_s3] sm:$0xf] }
 0x582   : > { %1673 = vmatpush.bf16.msrb.mxu2 %v2761_v22  ;;  %v2973_v22 = vld [vmem:[%s3280_s3 + $0xc] sm:$0xf0] }
 0x588   : > { %1104 = vrot.lane.b32.xlu1 %v1097_v23, %s3157_s29  ;;  %v2762_v23 = vld [vmem:[%s3280_s3 + $0xb0] sm:$0xf0] }
 0x589   : > { %v2765_v28 = vor.u32 %v2991_v21, %v2762_v23  ;;  %v2709_v21 = vor.u32 %v2976_v16, %v2706_v18  ;;  %v2971_v23 = vld [vmem:[%s3280_s3 + $0x4] sm:$0xf] }
 0x58b   : > { %1687 = vmatpush.bf16.msra.mxu3 %v2765_v28  ;;  %v2681_v28 = vor.u32 %v2973_v22, %v2680_v19 }
 0x590   : > { %1320 = vrot.lane.b32.xlu1 %v1312_v24, %s3154_s23  ;;  %v2768_v24 = vld [vmem:[%s3280_s3 + $0xa8] sm:$0xf] }
 0x5a6   : > { %v1315_v25 = vpop.f32.mrf.mxu0 }
 0x5a7   : > { %1322 = vrot.lane.b32.xlu2 %v1315_v25, %s3154_s23  ;;  %v2994_v25 = vld [vmem:[%s3280_s3 + $0xb4] sm:$0xf0] }
 0x5a8   : > { %v2769_v29 = vor.u32 %v2994_v25, %v2768_v24  ;;  %v2682_v24 = vld [vmem:[%s3280_s3 + $0x10] sm:$0xf0] }
 0x5aa   : > { %1701 = vmatpush.bf16.msrb.mxu0 %v2769_v29  ;;  %v2685_v29 = vor.u32 %v2971_v23, %v2682_v24 }
 0x5e2   : > { %v1212_v32 = vpop.permute.xlu0 %1211 }
 0x5ea   : > { %v1214_v36 = vpop.permute.xlu1 %1213 }
 0x5f2   : > { %v1103_v26 = vpop.permute.xlu1 %1102 }
 0x5f3   : > { %1109 = vst.msk [vmem:[#allocation2] sm:$0xff] %vm1108_vm15, %v1103_v26  ;;  %v2746_v26 = vld [vmem:[%s3280_s3 + $0x90] sm:$0xf0] }
 0x5f4   : > { %1218 = vst.msk [vmem:[#allocation2] sm:$0xff] %vm1217_vm0, %v1212_v32  ;;  %v2752_v32 = vld [vmem:[%s3280_s3 + $0x88] sm:$0xf] }
 0x5fa   : > { %v1105_v37 = vpop.permute.xlu1 %1104 }
 0x5fb   : > { %1110 = vst.msk [vmem:[#allocation2 + $0x8] sm:$0xff] %vm1108_vm15, %v1105_v37  ;;  %v2990_v37 = vld [vmem:[%s3280_s3 + $0x94] sm:$0xf0] }
 0x5fc   : > { %1219 = vst.msk [vmem:[#allocation2 + $0x8] sm:$0xff] %vm1217_vm0, %v1214_v36  ;;  %v2745_v36 = vor.u32 %v2989_v34, %v2744_v33  ;;  %v2689_v33 = vor.u32 %v2974_v27, %v2688_v30  ;;  %v2690_v34 = vld [vmem:[%s3280_s3 + $0x18] sm:$0xf0] }
 0x5fe   : > { %1674 = vmatpush.bf16.msrb.mxu2 %v2745_v36  ;;  %v2693_v36 = vor.u32 %v2972_v31, %v2690_v34 }
 0x601   : > { %v1323_v38 = vpop.permute.xlu2 %1322 }
 0x602   : > { %1328 = vst.msk [vmem:[#allocation2 + $0x8] sm:$0xff] %vm1326_vm1, %v1323_v38  ;;  %v1321_v39 = vpop.permute.xlu1 %1320  ;;  %v2749_v38 = vor.u32 %v2987_v35, %v2746_v26 }
 0x603   : > { %1327 = vst.msk [vmem:[#allocation2] sm:$0xff] %vm1326_vm1, %v1321_v39  ;;  %v2753_v39 = vor.u32 %v2990_v37, %v2752_v32 }
 0x604   : > { %1688 = vmatpush.bf16.msra.mxu3 %v2749_v38 }
 0x605   : > { %1702 = vmatpush.bf16.msrb.mxu0 %v2753_v39 }
 0x609   : > { %v1330_v40 = vld [vmem:[#allocation2 + $0x8] sm:$0xff] }
 0x60a   : > { %v1329_v41 = vld [vmem:[#allocation2] sm:$0xff] }
 0x60b   : > { %v1331_v42 = vpack.c.bf16 %v1330_v40, %v1329_v41  ;;  %v2988_v40 = vld [vmem:[%s3280_s3 + $0x8c] sm:$0xf]  ;;  %v2754_v41 = vld [vmem:[%s3280_s3 + $0x98] sm:$0xf0] }
 0x60d   : > { %1408 = vmatmul.bf16.vlgmr.msrb.gmra.mxu1 %v1331_v42  ;;  %v2757_v42 = vor.u32 %v2988_v40, %v2754_v41 }
 0x60f   : > { %1716 = vmatpush.bf16.msra.mxu1 %v2757_v42 }
 0x68a   : > { %v1409_v44 = vpop.f32.mrf.mxu1 }
 0x68b   : > { %v1410_v45 = vadd.f32 %v3067_v43, %v1409_v44  ;;  %v2985_v44 = vld [vmem:[%s3280_s3 + $0x6c] sm:$0xf0] }
 0x68d   : > { %v3530_v46 = vadd.f32 %v1410_v45, %v3312_v2  ;;  %v2983_v45 = vld [vmem:[%s3280_s3 + $0x64] sm:$0xf] }
 0x68f   : > { %1418 = vadd.xlane.f32.xlu1 %v3530_v46 }
 0x692   : > { %v1411_v47 = vpop.f32.mrf.mxu1 }
 0x693   : > { %v1412_v48 = vadd.f32 %v3067_v43, %v1411_v47  ;;  %v2728_v43 = vld [vmem:[%s3280_s3 + $0x60] sm:$0xf] }
 0x694   : > { %v2729_v47 = vor.u32 %v2985_v44, %v2728_v43 }
 0x695   : > { %v3534_v49 = vadd.f32 %v1412_v48, %v3318_v3  ;;  %v2730_v48 = vld [vmem:[%s3280_s3 + $0x70] sm:$0xf0] }
 0x696   : > { %1675 = vmatpush.bf16.msrb.mxu2 %v2729_v47 }
 0x697   : > { %1420 = vadd.xlane.f32.xlu0 %v3534_v49 }
 0x69a   : > { %1676 = vmatpush.bf16.msrb.mxu2 %v2713_v59 }
 0x69e   : > { %1677 = vmatpush.bf16.msrb.mxu2 %v2697_v7 }
 0x6a2   : > { %1678 = vmatpush.bf16.msrb.mxu2 %v2681_v28 }
 0x702   : > { %v1419_v50 = vpop.xlane.xlu1 %1418 }
 0x703   : > { %v1422_v51 = vmul.f32 %v1419_v50, %v3321_v10  ;;  %v2736_v50 = vld [vmem:[%s3280_s3 + $0x68] sm:$0xf] }
 0x705   : > { %v3539_v2 = vsub.f32 %v3530_v46, %v1422_v51  ;;  %v2986_v51 = vld [vmem:[%s3280_s3 + $0x74] sm:$0xf0] }
 0x707   : > { %v1426_v52 = vmul.f32 %v3539_v2, %v3539_v2 }
 0x709   : > { %1428 = vadd.xlane.f32.xlu2 %v1426_v52  ;;  %v2733_v52 = vor.u32 %v2983_v45, %v2730_v48 }
 0x70a   : > { %v1421_v53 = vpop.xlane.xlu0 %1420 }
 0x70b   : > { %v1423_v3 = vmul.f32 %v1421_v53, %v3321_v10  ;;  %v2737_v53 = vor.u32 %v2986_v51, %v2736_v50  ;;  %1689 = vmatpush.bf16.msra.mxu3 %v2733_v52  ;;  %v3068_v52 = vld [vmem:[%s3965_s2] ss:$0 sm:$0xff] }
 0x70d   : > { %v3545_v54 = vsub.f32 %v3534_v49, %v1423_v3  ;;  %v2984_v3 = vld [vmem:[%s3280_s3 + $0x6c] sm:$0xf]  ;;  %1703 = vmatpush.bf16.msrb.mxu0 %v2737_v53 }
 0x70f   : > { %v1427_v55 = vmul.f32 %v3545_v54, %v3545_v54  ;;  %1690 = vmatpush.bf16.msra.mxu3 %v2717_v62 }
 0x711   : > { %1430 = vadd.xlane.f32.xlu1 %v1427_v55  ;;  %v2738_v55 = vld [vmem:[%s3280_s3 + $0x78] sm:$0xf0]  ;;  %1704 = vmatpush.bf16.msrb.mxu0 %v2721_v63 }
 0x712   : > { %v2741_v56 = vor.u32 %v2984_v3, %v2738_v55 }
 0x713   : > { %1691 = vmatpush.bf16.msra.mxu3 %v2701_v12 }
 0x714   : > { %1717 = vmatpush.bf16.msra.mxu1 %v2741_v56 }
 0x715   : > { %1705 = vmatpush.bf16.msrb.mxu0 %v2705_v14 }
 0x717   : > { %1692 = vmatpush.bf16.msra.mxu3 %v2685_v29 }
 0x718   : > { %1718 = vmatpush.bf16.msra.mxu1 %v2725_v17  ;;  %v1504_v17 = vperm.slane %v3628_v60, 1 }
 0x719   : > { %1706 = vmatpush.bf16.msrb.mxu0 %v2689_v33 }
 0x71c   : > { %1719 = vmatpush.bf16.msra.mxu1 %v2709_v21 }
 0x720   : > { %1720 = vmatpush.bf16.msra.mxu1 %v2693_v36 }
 0x77c   : > { %v1429_v20 = vpop.xlane.xlu2 %1428 }
 0x77d   : > { %v1432_v25 = vmul.f32 %v1429_v20, %v3321_v10 }
 0x77f   : > { %v1434_v35 = vadd.f32 1e-06, %v1432_v25 }
 0x781   : > { %3109 = vrsqrt.f32 %v1434_v35  ;;  %vm1442_vm3 = vweird.f32 %v1434_v35 }
 0x784   : > { %v1431_v26 = vpop.xlane.xlu1 %1430 }
 0x785   : > { %v1433_v32 = vmul.f32 %v1431_v26, %v3321_v10 }
 0x787   : > { %v3110_v37 = vpop.eup %3109  ;;  %v1435_v38 = vadd.f32 1e-06, %v1433_v32 }
 0x788   : > { %v1437_v39 = vmul.f32 %v3110_v37, %v1434_v35  ;;  %vm1443_vm2 = vweird.f32 %v3110_v37 }
 0x789   : > { %3111 = vrsqrt.f32 %v1435_v38  ;;  %vm1444_vm4 = vmor %vm1442_vm3, %vm1443_vm2  ;;  %vm1452_vm6 = vweird.f32 %v1435_v38 }
 0x78a   : > { %v1438_v40 = vmul.f32 %v3110_v37, %v1437_v39 }
 0x78c   : > { %v1439_v41 = vmul.f32 0.5, %v1438_v40 }
 0x78e   : > { %v1440_v42 = vsub.f32 1.5, %v1439_v41 }
 0x78f   : > { %v3112_v43 = vpop.eup %3111 }
 0x790   : > { %v1441_v44 = vmul.f32 %v3110_v37, %v1440_v42  ;;  %v1447_v45 = vmul.f32 %v3112_v43, %v1435_v38  ;;  %vm1453_vm5 = vweird.f32 %v3112_v43 }
 0x791   : > { %vm1454_vm7 = vmor %vm1452_vm6, %vm1453_vm5 }
 0x792   : > { %v1448_v47 = vmul.f32 %v3112_v43, %v1447_v45  ;;  %v1445_v48 = vsel %vm1444_vm4, %v3110_v37, %v1441_v44 }
 0x793   : > { %v1456_v10 = vmul.f32 %v1445_v48, %v3539_v2 }
 0x794   : > { %v1449_v50 = vmul.f32 0.5, %v1448_v47 }
 0x795   : > { %v1461_v56 = vmul.f32 %v3068_v52, %v1456_v10 }
 0x796   : > { %v1450_v51 = vsub.f32 1.5, %v1449_v50 }
 0x797   : > { %v1466_v2 = vadd.f32 %v3069_v57, %v1461_v56 }
 0x798   : > { %v1451_v53 = vmul.f32 %v3112_v43, %v1450_v51 }
 0x79a   : > { %v1455_v3 = vsel %vm1454_vm7, %v3112_v43, %v1451_v53 }
 0x79b   : > { %v1457_v55 = vmul.f32 %v1455_v3, %v3545_v54  ;;  %v1506_v54 = vperm.slane %v3628_v60, 3 }
 0x79d   : > { %v1462_v13 = vmul.f32 %v3068_v52, %v1457_v55 }
 0x79f   : > { %v1467_v58 = vadd.f32 %v3069_v57, %v1462_v13 }
 0x7a1   : > { %v1468_v59 = vpack.c.bf16 %v1467_v58, %v1466_v2 }
 0x7a3   : > { %1679 = vmatmul.bf16.vlgmr.msrb.gmra.mxu2 %v1468_v59  ;;  %1693 = vmatmul.bf16.vlgmr.msra.gmra.mxu3 %v1468_v59 }
 0x7a4   : > { %1707 = vmatmul.bf16.vlgmr.msrb.gmra.mxu0 %v1468_v59  ;;  %1721 = vmatmul.bf16.vlgmr.msra.gmra.mxu1 %v1468_v59 }
 0x821   : > { %v1708_v15 = vpop.f32.mrf.mxu0  ;;  %v1722_v62 = vpop.f32.mrf.mxu1 }
 0x822   : > { %v3632_v63 = vadd.f32 %v1708_v15, %v1505_v61  ;;  %v3634_v0 = vadd.f32 %v1722_v62, %v1506_v54 }
 0x824   : > { %v3639_v4 = vmul.f32 0.70710677, %v3632_v63  ;;  %v3642_v5 = vmul.f32 0.70710677, %v3634_v0 }
 0x826   : > { %v3645_v6 = vand.u32 2147483647, %v3639_v4  ;;  %v3648_v7 = vand.u32 2147483647, %v3642_v5  ;;  %v1680_v8 = vpop.f32.mrf.mxu2  ;;  %v1694_v9 = vpop.f32.mrf.mxu3 }
 0x827   : > { %v3652_v11 = vadd.f32 %v1680_v8, %v1503_v1  ;;  %v3656_v12 = vadd.f32 %v1694_v9, %v1504_v17 }
 0x828   : > { %v1753_v14 = vmul.f32 0.3275911, %v3645_v6  ;;  %v1754_v16 = vmul.f32 0.3275911, %v3648_v7 }
 0x829   : > { %v3661_v18 = vmul.f32 0.70710677, %v3652_v11  ;;  %v3664_v19 = vmul.f32 0.70710677, %v3656_v12  ;;  %v1710_v29 = vpop.f32.mrf.mxu0  ;;  %v1724_v37 = vpop.f32.mrf.mxu1 }
 0x82a   : > { %v1761_v20 = vadd.f32 1.0, %v1753_v14  ;;  %v1762_v21 = vadd.f32 1.0, %v1754_v16  ;;  %v3679_v35 = vadd.f32 %v1710_v29, %v1505_v61  ;;  %v3685_v47 = vadd.f32 %v1724_v37, %v1506_v54 }
 0x82b   : > { %v3667_v22 = vand.u32 2147483647, %v3661_v18  ;;  %v3670_v23 = vand.u32 2147483647, %v3664_v19  ;;  %v1962_v29 = vsub.f32 0.0, %v3648_v7 }
 0x82c   : > { %3113 = vrcp.f32 %v1761_v20  ;;  %v1808_v26 = vand.u32 2147483648, %v1761_v20  ;;  %v1806_v39 = vand.u32 2147483647, %v1761_v20  ;;  %v1823_v40 = vand.u32 2147483648, %v1762_v21 }
 0x82d   : > { %3115 = vrcp.f32 %v1762_v21  ;;  %v1751_v24 = vmul.f32 0.3275911, %v3667_v22  ;;  %v1752_v25 = vmul.f32 0.3275911, %v3670_v23  ;;  %v1821_v42 = vand.u32 2147483647, %v1762_v21 }
 0x82e   : > { %v3683_v43 = vmul.f32 0.70710677, %v3679_v35  ;;  %vm1802_vm10 = vweird.f32 %v1761_v20  ;;  %vm1817_vm11 = vweird.f32 %v1762_v21  ;;  %v1809_v48 = vor.u32 1.1754944e-38, %v1808_v26  ;;  %v1682_v26 = vpop.f32.mrf.mxu2 }
 0x82f   : > { %v3674_v28 = vadd.f32 1.0, %v1751_v24  ;;  %v3676_v27 = vadd.f32 1.0, %v1752_v25  ;;  %vm1807_vm13 = vcmp.eq.f32.partialorder %v1806_v39, 8.507059e+37  ;;  %v1824_v53 = vor.u32 1.1754944e-38, %v1823_v40 }
 0x830   : > { %v3689_v10 = vand.u32 2147483647, %v3683_v43  ;;  %vm1822_vm15 = vcmp.eq.f32.partialorder %v1821_v42, 8.507059e+37  ;;  %v3701_v59 = vmul.f32 0.70710677, %v3685_v47  ;;  %v1961_v24 = vsub.f32 0.0, %v3645_v6 }
 0x831   : > { %3117 = vrcp.f32 %v3674_v28  ;;  %v1778_v62 = vand.u32 2147483648, %v3674_v28  ;;  %vm1772_vm1 = vweird.f32 %v3674_v28  ;;  %v1970_v39 = vmul.f32 %v1962_v29, %v3648_v7 }
 0x832   : > { %v3114_v30 = vpop.eup %3113  ;;  %3119 = vrcp.f32 %v3676_v27  ;;  %v1757_v58 = vmul.f32 0.3275911, %v3689_v10  ;;  %v3712_v25 = vand.u32 2147483647, %v3701_v59  ;;  %vm1787_vm6 = vweird.f32 %v3676_v27 }
 0x833   : > { %v3116_v31 = vpop.eup %3115  ;;  %v1798_v33 = vmul.f32 %v3114_v30, %v1761_v20  ;;  %vm1803_vm8 = vweird.f32 %v3114_v30  ;;  %v1776_v20 = vand.u32 2147483647, %v3674_v28  ;;  %v1981_v7 = vmul.f32 1.442695, %v1970_v39 }
 0x834   : > { %v1813_v34 = vmul.f32 %v3116_v31, %v1762_v21  ;;  %vm1818_vm9 = vweird.f32 %v3116_v31  ;;  %vm1804_vm12 = vmor %vm1802_vm10, %vm1803_vm8  ;;  %v1765_v9 = vadd.f32 1.0, %v1757_v58  ;;  %v1965_v39 = vsub.f32 0.0, %v3689_v10 }
 0x835   : > { %v1799_v36 = vsub.f32 1.0, %v1798_v33  ;;  %vm1819_vm14 = vmor %vm1817_vm11, %vm1818_vm9  ;;  %vm1777_vm3 = vcmp.eq.f32.partialorder %v1776_v20, 8.507059e+37 }
 0x836   : > { %v1814_v32 = vsub.f32 1.0, %v1813_v34  ;;  %3121 = vrcp.f32 %v1765_v9  ;;  %v1779_v34 = vor.u32 1.1754944e-38, %v1778_v62  ;;  %v1791_v62 = vand.u32 2147483647, %v3676_v27 }
 0x837   : > { %v1800_v38 = vmul.f32 %v3114_v30, %v1799_v36  ;;  %v3118_v44 = vpop.eup %3117  ;;  %vm1862_vm8 = vweird.f32 %v1765_v9 }
 0x838   : > { %v1815_v41 = vmul.f32 %v3116_v31, %v1814_v32  ;;  %v1768_v51 = vmul.f32 %v3118_v44, %v3674_v28  ;;  %v3692_v3 = vpop.eup %3119  ;;  %vm1773_vm0 = vweird.f32 %v3118_v44  ;;  %v1969_v32 = vmul.f32 %v1961_v24, %v3645_v6 }
 0x839   : > { %v1801_v45 = vadd.f32 %v3114_v30, %v1800_v38  ;;  %v1783_v8 = vmul.f32 %v3692_v3, %v3676_v27  ;;  %vm1774_vm2 = vmor %vm1772_vm1, %vm1773_vm0  ;;  %v1758_v38 = vmul.f32 0.3275911, %v3712_v25  ;;  %vm1788_vm4 = vweird.f32 %v3692_v3 }
 0x83a   : > { %v1816_v50 = vadd.f32 %v3116_v31, %v1815_v41  ;;  %v1769_v57 = vsub.f32 1.0, %v1768_v51  ;;  %v3731_v51 = vmul.f32 0.5, %v3632_v63  ;;  %vm3745_vm7 = vmor %vm1787_vm6, %vm1788_vm4  ;;  %vm1792_vm11 = vcmp.eq.f32.partialorder %v1791_v62, 8.507059e+37 }
 0x83b   : > { %v1805_v52 = vsel %vm1804_vm12, %v3114_v30, %v1801_v45  ;;  %v1784_v36 = vsub.f32 1.0, %v1783_v8  ;;  %v3727_v45 = vadd.f32 %v1682_v26, %v1503_v1  ;;  %v1793_v8 = vand.u32 2147483648, %v3676_v27 }
 0x83c   : > { %v3694_v55 = vsel %vm1807_vm13, %v1809_v48, %v1805_v52  ;;  %v1820_v56 = vsel %vm1819_vm14, %v3116_v31, %v1816_v50  ;;  %v1770_v54 = vmul.f32 %v3118_v44, %v1769_v57  ;;  %v3122_v40 = vpop.eup %3121  ;;  %v1979_v52 = vmul.f32 1.442695, %v1969_v32 }
 0x83d   : > { %v1889_v13 = vmul.f32 1.0614054, %v3694_v55  ;;  %v3697_v2 = vsel %vm1822_vm15, %v1824_v53, %v1820_v56  ;;  %v1785_v42 = vmul.f32 %v3692_v3, %v1784_v36  ;;  %v1858_v6 = vmul.f32 %v3122_v40, %v1765_v9 }
 0x83e   : > { %v1890_v61 = vmul.f32 1.0614054, %v3697_v2  ;;  %v1771_v16 = vadd.f32 %v3118_v44, %v1770_v54  ;;  %v1866_v56 = vand.u32 2147483647, %v1765_v9  ;;  %v1868_v57 = vand.u32 2147483648, %v1765_v9 }
 0x83f   : > { %v1897_v15 = vadd.f32 -1.4531521, %v1889_v13  ;;  %v1859_v53 = vsub.f32 1.0, %v1858_v6  ;;  %v1786_v58 = vadd.f32 %v3692_v3, %v1785_v42  ;;  %v3738_v1 = vmul.f32 0.70710677, %v3727_v45 }
 0x840   : > { %v1898_v14 = vadd.f32 -1.4531521, %v1890_v61  ;;  %v1775_v30 = vsel %vm1774_vm2, %v3118_v44, %v1771_v16  ;;  %v3723_v44 = vadd.f32 1.0, %v1758_v38  ;;  %vm1863_vm5 = vweird.f32 %v3122_v40 }
 0x841   : > { %v1905_v21 = vmul.f32 %v1897_v15, %v3694_v55  ;;  %v3718_v37 = vsel %vm1777_vm3, %v1779_v34, %v1775_v30  ;;  %v1860_v54 = vmul.f32 %v3122_v40, %v1859_v53  ;;  %v1959_v15 = vsub.f32 0.0, %v3667_v22  ;;  %vm1864_vm10 = vmor %vm1862_vm8, %vm1863_vm5  ;;  %v3026_v30 = vld [vmem:[%s3291_s1 + $0xb8] sm:$0xff] }
 0x842   : > { %v1906_v33 = vmul.f32 %v1898_v14, %v3697_v2  ;;  %v1887_v50 = vmul.f32 1.0614054, %v3718_v37  ;;  %3123 = vrcp.f32 %v3723_v44  ;;  %vm1867_vm9 = vcmp.eq.f32.partialorder %v1866_v56, 8.507059e+37  ;;  %2339 = vmatpush.bf16.msra.mxu0 %v3026_v30 }
 0x843   : > { %v1913_v31 = vadd.f32 1.4214138, %v1905_v21  ;;  %v1861_v16 = vadd.f32 %v3122_v40, %v1860_v54  ;;  %v1869_v20 = vor.u32 1.1754944e-38, %v1868_v57  ;;  %3125 = vpow2.f32 %v1979_v52 }
 0x844   : > { %v1914_v41 = vadd.f32 1.4214138, %v1906_v33  ;;  %v1895_v63 = vadd.f32 -1.4531521, %v1887_v50  ;;  %v3752_v29 = vand.u32 2147483647, %v3738_v1  ;;  %v1790_v34 = vsel %vm3745_vm7, %v3692_v3, %v1786_v58  ;;  %v1696_v58 = vpop.f32.mrf.mxu3 }
 0x845   : > { %v1921_v28 = vmul.f32 %v1913_v31, %v3694_v55  ;;  %v3034_v31 = vld [vmem:[%s3291_s1 + $0xf8] sm:$0xff]  ;;  %v1865_v9 = vsel %vm1864_vm10, %v3122_v40, %v1861_v16  ;;  %3127 = vpow2.f32 %v1981_v7  ;;  %v1794_v36 = vor.u32 1.1754944e-38, %v1793_v8  ;;  %v3033_v7 = vld [vmem:[%s3291_s1 + $0xf0] sm:$0xff] }
 0x846   : > { %v1922_v13 = vmul.f32 %v1914_v41, %v3697_v2  ;;  %v1903_v27 = vmul.f32 %v1895_v63, %v3718_v37  ;;  %v3760_v26 = vsel %vm1867_vm9, %v1869_v20, %v1865_v9  ;;  %2353 = vmatpush.bf16.msrb.mxu1 %v3034_v31  ;;  %v1967_v32 = vmul.f32 %v1959_v15, %v3667_v22  ;;  %v3024_v20 = vld [vmem:[%s3291_s1 + $0xa8] sm:$0xff]  ;;  %v3009_v9 = vld [vmem:[%s3291_s1 + $0x30] sm:$0xff] }
 0x847   : > { %v1929_v48 = vadd.f32 -0.28449672, %v1921_v28  ;;  %v1893_v38 = vmul.f32 1.0614054, %v3760_v26  ;;  %v3768_v40 = vsel %vm1792_vm11, %v1794_v36, %v1790_v34  ;;  %v1755_v42 = vmul.f32 0.3275911, %v3752_v29 }
 0x848   : > { %v3749_v21 = vpop.eup %3123  ;;  %v1930_v24 = vadd.f32 -0.28449672, %v1922_v13  ;;  %v1911_v6 = vadd.f32 1.4214138, %v1903_v27  ;;  %v1883_v22 = vand.u32 2147483648, %v3723_v44  ;;  %v1973_v54 = vmul.f32 %v1965_v39, %v3689_v10  ;;  %v3017_v36 = vld [vmem:[%s3291_s1 + $0x70] sm:$0xff] }
 0x849   : > { %v1937_v61 = vmul.f32 %v1929_v48, %v3694_v55  ;;  %v1873_v28 = vmul.f32 %v3749_v21, %v3723_v44  ;;  %v3025_v48 = vld [vmem:[%s3291_s1 + $0xb0] sm:$0xff]  ;;  %v1901_v52 = vadd.f32 -1.4531521, %v1893_v38  ;;  %v3126_v53 = vpop.eup %3125  ;;  %vm1878_vm12 = vweird.f32 %v3749_v21 }
 0x84a   : > { %v1938_v3 = vmul.f32 %v1930_v24, %v3697_v2  ;;  %v1881_v57 = vand.u32 2147483647, %v3723_v44  ;;  %v3778_v13 = vadd.f32 1.0, %v1755_v42  ;;  %2340 = vmatpush.bf16.msra.mxu0 %v3025_v48  ;;  %v1888_v63 = vmul.f32 1.0614054, %v3768_v40  ;;  %2354 = vmatpush.bf16.msrb.mxu1 %v3033_v7  ;;  %v3032_v24 = vld [vmem:[%s3291_s1 + $0xe8] sm:$0xff] }
 0x84b   : > { %v1945_v33 = vadd.f32 0.2548296, %v1937_v61  ;;  %v1874_v41 = vsub.f32 1.0, %v1873_v28  ;;  %v3010_v61 = vld [vmem:[%s3291_s1 + $0x38] sm:$0xff]  ;;  %vm1877_vm13 = vweird.f32 %v3723_v44  ;;  %v1966_v15 = vsub.f32 0.0, %v3712_v25  ;;  %v3128_v62 = vpop.eup %3127  ;;  %v3023_v42 = vld [vmem:[%s3291_s1 + $0xa0] sm:$0xff] }
 0x84c   : > { %v1946_v8 = vadd.f32 0.2548296, %v1938_v3  ;;  %v1909_v14 = vmul.f32 %v1901_v52, %v3760_v26  ;;  %3129 = vrcp.f32 %v3778_v13  ;;  %2311 = vmatpush.bf16.msra.mxu2 %v3010_v61  ;;  %v1919_v44 = vmul.f32 %v1911_v6, %v3718_v37  ;;  %vm1879_vm14 = vmor %vm1877_vm13, %vm1878_vm12  ;;  %v3031_v6 = vld [vmem:[%s3291_s1 + $0xe0] sm:$0xff]  ;;  %v3008_v7 = vld [vmem:[%s3291_s1 + $0x28] sm:$0xff] }
 0x84d   : > { %v1953_v50 = vmul.f32 %v1945_v33, %v3694_v55  ;;  %v1875_v56 = vmul.f32 %v3749_v21, %v1874_v41  ;;  %v3018_v55 = vld [vmem:[%s3291_s1 + $0x78] sm:$0xff]  ;;  %v1884_v30 = vor.u32 1.1754944e-38, %v1883_v22  ;;  %v3798_v31 = vadd.f32 %v1696_v58, %v1504_v17  ;;  %v3016_v58 = vld [vmem:[%s3291_s1 + $0x68] sm:$0xff] }
 0x84e   : > { %2325 = vmatpush.bf16.msrb.mxu3 %v3018_v55  ;;  %v1960_v33 = vsub.f32 0.0, %v3670_v23  ;;  %v1917_v27 = vadd.f32 1.4214138, %v1909_v14  ;;  %vm1882_vm15 = vcmp.eq.f32.partialorder %v1881_v57, 8.507059e+37  ;;  %2341 = vmatpush.bf16.msra.mxu0 %v3024_v20  ;;  %v1975_v28 = vmul.f32 1.442695, %v1967_v32 }
 0x84f   : > { %v1876_v16 = vadd.f32 %v3749_v21, %v1875_v56  ;;  %v3791_v10 = vmul.f32 %v3126_v53, %v1953_v50  ;;  %v1896_v38 = vadd.f32 -1.4531521, %v1888_v63  ;;  %v1987_v39 = vmul.f32 1.442695, %v1973_v54  ;;  %2355 = vmatpush.bf16.msrb.mxu1 %v3032_v24  ;;  %v3022_v54 = vld [vmem:[%s3291_s1 + $0x98] sm:$0xff] }
 0x850   : > { %v1954_v60 = vmul.f32 %v1946_v8, %v3697_v2  ;;  %v1925_v17 = vmul.f32 %v1917_v27, %v3760_v26  ;;  %2312 = vmatpush.bf16.msra.mxu2 %v3009_v9  ;;  %v1927_v32 = vadd.f32 -0.28449672, %v1919_v44  ;;  %v3813_v50 = vmul.f32 0.70710677, %v3798_v31  ;;  %v3007_v44 = vld [vmem:[%s3291_s1 + $0x20] sm:$0xff] }
 0x851   : > { %v1880_v34 = vsel %vm1879_vm14, %v3749_v21, %v1876_v16  ;;  %v1974_v21 = vmul.f32 %v1966_v15, %v3712_v25  ;;  %v2001_v48 = vsub.f32 1.0, %v3791_v10  ;;  %vm2009_vm0 = vcmp.ge.f32.partialorder %v3639_v4, 0.0  ;;  %v3030_v15 = vld [vmem:[%s3291_s1 + $0xd8] sm:$0xff]  ;;  %v3020_v4 = vld [vmem:[%s3291_s1 + $0x88] sm:$0xff] }
 0x852   : > { %v3804_v3 = vsel %vm1882_vm15, %v1884_v30, %v1880_v34  ;;  %2326 = vmatpush.bf16.msrb.mxu3 %v3017_v36  ;;  %v3816_v52 = vpop.eup %3129  ;;  %v3820_v2 = vmul.f32 %v1960_v33, %v3670_v23  ;;  %v1933_v25 = vadd.f32 -0.28449672, %v1925_v17  ;;  %2342 = vmatpush.bf16.msra.mxu0 %v3023_v42  ;;  %v1904_v53 = vmul.f32 %v1896_v38, %v3768_v40  ;;  %v3015_v30 = vld [vmem:[%s3291_s1 + $0x60] sm:$0xff]  ;;  %v3021_v38 = vld [vmem:[%s3291_s1 + $0x90] sm:$0xff] }
 0x853   : > { %v1894_v41 = vmul.f32 1.0614054, %v3804_v3  ;;  %3131 = vpow2.f32 %v1987_v39  ;;  %v1828_v56 = vmul.f32 %v3816_v52, %v3778_v13  ;;  %v3827_v57 = vand.u32 2147483647, %v3813_v50  ;;  %2356 = vmatpush.bf16.msrb.mxu1 %v3031_v6  ;;  %v3029_v39 = vld [vmem:[%s3291_s1 + $0xd0] sm:$0xff]  ;;  %v3006_v6 = vld [vmem:[%s3291_s1 + $0x18] sm:$0xff] }
 0x854   : > { %v3830_v61 = vmul.f32 %v3128_v62, %v1954_v60  ;;  %v1941_v23 = vmul.f32 %v1933_v25, %v3760_v26  ;;  %v1989_v63 = vmul.f32 1.442695, %v1974_v21  ;;  %2313 = vmatpush.bf16.msra.mxu2 %v3008_v7  ;;  %v2017_v8 = vsub.f32 0.0, %v2001_v48  ;;  %v3014_v7 = vld [vmem:[%s3291_s1 + $0x58] sm:$0xff] }
 0x855   : > { %v1902_v22 = vadd.f32 -1.4531521, %v1894_v41  ;;  %v1829_v14 = vsub.f32 1.0, %v1828_v56  ;;  %v1838_v16 = vand.u32 2147483648, %v3778_v13  ;;  %v1756_v20 = vmul.f32 0.3275911, %v3827_v57 }
 0x856   : > { %2327 = vmatpush.bf16.msrb.mxu3 %v3016_v58  ;;  %v1935_v62 = vmul.f32 %v1927_v32, %v3718_v37  ;;  %3133 = vpow2.f32 %v1975_v28  ;;  %v1949_v24 = vadd.f32 0.2548296, %v1941_v23  ;;  %2343 = vmatpush.bf16.msra.mxu0 %v3022_v54  ;;  %vm1833_vm1 = vweird.f32 %v3816_v52 }
 0x857   : > { %v1910_v55 = vmul.f32 %v1902_v22, %v3804_v3  ;;  %v1830_v33 = vmul.f32 %v3816_v52, %v1829_v14  ;;  %v1836_v27 = vand.u32 2147483647, %v3778_v13  ;;  %v3844_v34 = vadd.f32 1.0, %v1756_v20  ;;  %2357 = vmatpush.bf16.msrb.mxu1 %v3030_v15  ;;  %v3013_v20 = vld [vmem:[%s3291_s1 + $0x50] sm:$0xff] }
 0x858   : > { %v1912_v9 = vadd.f32 1.4214138, %v1904_v53  ;;  %v1957_v36 = vmul.f32 %v1949_v24, %v3760_v26  ;;  %3135 = vpow2.f32 %v1989_v63  ;;  %2314 = vmatpush.bf16.msra.mxu2 %v3007_v44  ;;  %v2002_v17 = vsub.f32 1.0, %v3830_v61 }
 0x859   : > { %v1918_v10 = vadd.f32 1.4214138, %v1910_v55  ;;  %v3132_v60 = vpop.eup %3131  ;;  %v1831_v41 = vadd.f32 %v3816_v52, %v1830_v33  ;;  %vm1832_vm2 = vweird.f32 %v3778_v13  ;;  %3137 = vrcp.f32 %v3844_v34 }
 0x85a   : > { %2328 = vmatpush.bf16.msrb.mxu3 %v3015_v30  ;;  %v1943_v21 = vadd.f32 0.2548296, %v1935_v62  ;;  %v1997_v26 = vmul.f32 %v3132_v60, %v1957_v36  ;;  %vm1834_vm3 = vmor %vm1832_vm2, %vm1833_vm1  ;;  %v1839_v32 = vor.u32 1.1754944e-38, %v1838_v16  ;;  %2344 = vmatpush.bf16.msra.mxu0 %v3021_v38  ;;  %v2025_v25 = vsel %vm2009_vm0, %v2001_v48, %v2017_v8  ;;  %v3028_v48 = vld [vmem:[%s3291_s1 + $0xc8] sm:$0xff]  ;;  %v3005_v16 = vld [vmem:[%s3291_s1 + $0x10] sm:$0xff] }
 0x85b   : > { %v1926_v28 = vmul.f32 %v1918_v10, %v3804_v3  ;;  %v1835_v22 = vsel %vm1834_vm3, %v3816_v52, %v1831_v41  ;;  %vm1837_vm4 = vcmp.eq.f32.partialorder %v1836_v27, 8.507059e+37  ;;  %v1963_v13 = vsub.f32 0.0, %v3752_v29  ;;  %2358 = vmatpush.bf16.msrb.mxu1 %v3029_v39  ;;  %v3027_v36 = vld [vmem:[%s3291_s1 + $0xc0] sm:$0xff]  ;;  %v3004_v60 = vld [vmem:[%s3291_s1 + $0x8] sm:$0xff] }
 0x85c   : > { %v3134_v53 = vpop.eup %3133  ;;  %v3863_v56 = vmul.f32 0.5, %v3634_v0  ;;  %v2005_v58 = vsub.f32 1.0, %v1997_v26  ;;  %v3866_v23 = vsel %vm1837_vm4, %v1839_v32, %v1835_v22  ;;  %2315 = vmatpush.bf16.msra.mxu2 %v3006_v6  ;;  %vm2010_vm5 = vcmp.ge.f32.partialorder %v3642_v5, 0.0  ;;  %v3012_v41 = vld [vmem:[%s3291_s1 + $0x48] sm:$0xff] }
 0x85d   : > { %v1934_v42 = vadd.f32 -0.28449672, %v1926_v28  ;;  %v2018_v52 = vsub.f32 0.0, %v2002_v17  ;;  %v1920_v55 = vmul.f32 %v1912_v9, %v3768_v40  ;;  %v1891_v63 = vmul.f32 1.0614054, %v3866_v23  ;;  %v3019_v9 = vld [vmem:[%s3291_s1 + $0x80] sm:$0xff] }
 0x85e   : > { %2329 = vmatpush.bf16.msrb.mxu3 %v3014_v7  ;;  %v3136_v0 = vpop.eup %3135  ;;  %v2033_v54 = vadd.f32 1.0, %v2025_v25  ;;  %v1951_v15 = vmul.f32 %v1943_v21, %v3718_v37  ;;  %v2021_v8 = vsub.f32 0.0, %v2005_v58  ;;  %2345 = vmatpush.bf16.msra.mxu0 %v3020_v4  ;;  %v3877_v24 = vmul.f32 1.442695, %v3820_v2 }
 0x85f   : > { %v1942_v61 = vmul.f32 %v1934_v42, %v3804_v3  ;;  %v3138_v62 = vpop.eup %3137  ;;  %vm2013_vm6 = vcmp.ge.f32.partialorder %v3683_v43, 0.0  ;;  %v1899_v10 = vadd.f32 -1.4531521, %v1891_v63  ;;  %v1971_v44 = vmul.f32 %v1963_v13, %v3752_v29  ;;  %2359 = vmatpush.bf16.msrb.mxu1 %v3028_v48 }
 0x860   : > { %v1733_v30 = vmul.f32 0.5, %v3679_v35  ;;  %v2029_v37 = vsel %vm2013_vm6, %v2005_v58, %v2021_v8  ;;  %v1843_v27 = vmul.f32 %v3138_v62, %v3844_v34  ;;  %2316 = vmatpush.bf16.msra.mxu2 %v3005_v16  ;;  %v2026_v2 = vsel %vm2010_vm5, %v2002_v17, %v2018_v52  ;;  %v3003_v58 = vld [vmem:[%s3291_s1] sm:$0xff] }
 0x861   : > { %v1950_v14 = vadd.f32 0.2548296, %v1942_v61  ;;  %v1928_v43 = vadd.f32 -0.28449672, %v1920_v55  ;;  %v2037_v28 = vadd.f32 1.0, %v2029_v37  ;;  %v1907_v29 = vmul.f32 %v1899_v10, %v3866_v23  ;;  %v3011_v61 = vld [vmem:[%s3291_s1 + $0x40] sm:$0xff] }
 0x862   : > { %2330 = vmatpush.bf16.msrb.mxu3 %v3013_v20  ;;  %v2041_v35 = vmul.f32 %v2033_v54, %v3731_v51  ;;  %v3890_v38 = vmul.f32 %v3134_v53, %v1951_v15  ;;  %2346 = vmatpush.bf16.msra.mxu0 %v3019_v9  ;;  %v1983_v42 = vmul.f32 1.442695, %v1971_v44  ;;  %v1853_v5 = vand.u32 2147483648, %v3844_v34 }
 0x863   : > { %v1958_v33 = vmul.f32 %v1950_v14, %v3804_v3  ;;  %v1844_v3 = vsub.f32 1.0, %v1843_v27  ;;  %v2045_v21 = vmul.f32 %v2037_v28, %v1733_v30  ;;  %v1915_v26 = vadd.f32 1.4214138, %v1907_v29  ;;  %2360 = vmatpush.bf16.msrb.mxu1 %v3027_v36 }
 0x864   : > { %vm1848_vm7 = vweird.f32 %v3138_v62  ;;  %v1851_v51 = vand.u32 2147483647, %v3844_v34  ;;  %2317 = vmatpush.bf16.msra.mxu2 %v3004_v60  ;;  %v1734_v25 = vmul.f32 0.5, %v3685_v47  ;;  %vm2014_vm8 = vcmp.ge.f32.partialorder %v3701_v59, 0.0 }
 0x865   : > { %v1998_v39 = vmul.f32 %v3136_v0, %v1958_v33  ;;  %v1845_v32 = vmul.f32 %v3138_v62, %v1844_v3  ;;  %v2049_v6 = vpack.c.bf16 %v2045_v21, %v2041_v35  ;;  %v1923_v22 = vmul.f32 %v1915_v26, %v3866_v23 }
 0x866   : > { %2331 = vmatpush.bf16.msrb.mxu3 %v3012_v41  ;;  %v1936_v13 = vmul.f32 %v1928_v43, %v3768_v40  ;;  %vm1847_vm9 = vweird.f32 %v3844_v34  ;;  %v2034_v4 = vadd.f32 1.0, %v2026_v2  ;;  %v1999_v48 = vsub.f32 1.0, %v3890_v38 }
 0x867   : > { %v2006_v17 = vsub.f32 1.0, %v1998_v39  ;;  %v1846_v53 = vadd.f32 %v3138_v62, %v1845_v32  ;;  %v1931_v52 = vadd.f32 -0.28449672, %v1923_v22  ;;  %vm1849_vm10 = vmor %vm1847_vm9, %vm1848_vm7  ;;  %v1854_v47 = vor.u32 1.1754944e-38, %v1853_v5  ;;  %2347 = vmatmul.bf16.vlgmr.msra.gmra.mxu0 %v2049_v6 }
 0x868   : > { %3139 = vpow2.f32 %v1983_v42  ;;  %vm1852_vm11 = vcmp.eq.f32.partialorder %v1851_v51, 8.507059e+37  ;;  %2318 = vmatpush.bf16.msra.mxu2 %v3003_v58  ;;  %v1964_v34 = vsub.f32 0.0, %v3827_v57  ;;  %v1944_v15 = vadd.f32 0.2548296, %v1936_v13 }
 0x869   : > { %v2022_v7 = vsub.f32 0.0, %v2006_v17  ;;  %v1850_v55 = vsel %vm1849_vm10, %v3138_v62, %v1846_v53  ;;  %v1939_v0 = vmul.f32 %v1931_v52, %v3866_v23  ;;  %v2042_v14 = vmul.f32 %v2034_v4, %v3863_v56 }
 0x86a   : > { %v1855_v54 = vsel %vm1852_vm11, %v1854_v47, %v1850_v55  ;;  %2332 = vmatpush.bf16.msrb.mxu3 %v3011_v61  ;;  %3141 = vpow2.f32 %v3877_v24  ;;  %v2015_v44 = vsub.f32 0.0, %v1999_v48  ;;  %v1972_v37 = vmul.f32 %v1964_v34, %v3827_v57 }
 0x86b   : > { %v2030_v59 = vsel %vm2014_vm8, %v2006_v17, %v2022_v7  ;;  %v1892_v8 = vmul.f32 1.0614054, %v1855_v54  ;;  %v1947_v20 = vadd.f32 0.2548296, %v1939_v0  ;;  %v1952_v27 = vmul.f32 %v1944_v15, %v3768_v40 }
 0x86c   : > { %v2038_v63 = vadd.f32 1.0, %v2030_v59  ;;  %vm2007_vm12 = vcmp.ge.f32.partialorder %v3661_v18, 0.0  ;;  %v1985_v28 = vmul.f32 1.442695, %v1972_v37  ;;  %vm2011_vm13 = vcmp.ge.f32.partialorder %v3738_v1, 0.0 }
 0x86d   : > { %v1900_v10 = vadd.f32 -1.4531521, %v1892_v8  ;;  %v1955_v30 = vmul.f32 %v1947_v20, %v3866_v23  ;;  %v2023_v24 = vsel %vm2007_vm12, %v1999_v48, %v2015_v44  ;;  %v1727_v23 = vmul.f32 0.5, %v3652_v11 }
 0x86e   : > { %v2046_v16 = vmul.f32 %v2038_v63, %v1734_v25  ;;  %v3140_v33 = vpop.eup %3139  ;;  %v2031_v39 = vadd.f32 1.0, %v2023_v24  ;;  %3143 = vpow2.f32 %v1985_v28  ;;  %v1731_v60 = vmul.f32 0.5, %v3727_v45 }
 0x86f   : > { %v1908_v9 = vmul.f32 %v1900_v10, %v1855_v54  ;;  %v1995_v36 = vmul.f32 %v3140_v33, %v1955_v30  ;;  %vm2008_vm14 = vcmp.ge.f32.partialorder %v3664_v19, 0.0  ;;  %vm2012_vm15 = vcmp.ge.f32.partialorder %v3813_v50, 0.0  ;;  %v3070_v19 = vld [vmem:[%s603_s21] ss:$0 sm:$0xff] }
 0x870   : > { %v2050_v62 = vpack.c.bf16 %v2046_v16, %v2042_v14  ;;  %v3142_v2 = vpop.eup %3141  ;;  %v2039_v21 = vmul.f32 %v2031_v39, %v1727_v23  ;;  %v1728_v13 = vmul.f32 0.5, %v3656_v12  ;;  %v1732_v7 = vmul.f32 0.5, %v3798_v31 }
 0x871   : > { %v1916_v56 = vadd.f32 1.4214138, %v1908_v9  ;;  %v2003_v43 = vsub.f32 1.0, %v1995_v36  ;;  %v1992_v29 = vmul.f32 %v3142_v2, %v1952_v27 }
 0x872   : > { %2361 = vmatmul.bf16.vlgmr.msrb.gmra.mxu1 %v2050_v62 }
 0x873   : > { %v1924_v35 = vmul.f32 %v1916_v56, %v1855_v54  ;;  %v2019_v38 = vsub.f32 0.0, %v2003_v43  ;;  %v2000_v3 = vsub.f32 1.0, %v1992_v29 }
 0x874   : > { %v3144_v51 = vpop.eup %3143 }
 0x875   : > { %v1932_v57 = vadd.f32 -0.28449672, %v1924_v35  ;;  %v2027_v40 = vsel %vm2011_vm13, %v2003_v43, %v2019_v38  ;;  %v2016_v5 = vsub.f32 0.0, %v2000_v3 }
 0x876   : > { %v2035_v18 = vadd.f32 1.0, %v2027_v40 }
 0x877   : > { %v1940_v41 = vmul.f32 %v1932_v57, %v1855_v54  ;;  %v2024_v11 = vsel %vm2008_vm14, %v2000_v3, %v2016_v5 }
 0x878   : > { %v2043_v26 = vmul.f32 %v2035_v18, %v1731_v60  ;;  %v2032_v22 = vadd.f32 1.0, %v2024_v11 }
 0x879   : > { %v1948_v42 = vadd.f32 0.2548296, %v1940_v41 }
 0x87a   : > { %v2047_v17 = vpack.c.bf16 %v2043_v26, %v2039_v21  ;;  %v2040_v58 = vmul.f32 %v2032_v22, %v1728_v13 }
 0x87b   : > { %v1956_v32 = vmul.f32 %v1948_v42, %v1855_v54 }
 0x87c   : > { %2319 = vmatmul.bf16.vlgmr.msra.gmra.mxu2 %v2047_v17 }
 0x87d   : > { %v1996_v6 = vmul.f32 %v3144_v51, %v1956_v32 }
 0x87f   : > { %v2004_v1 = vsub.f32 1.0, %v1996_v6 }
 0x881   : > { %v2020_v25 = vsub.f32 0.0, %v2004_v1 }
 0x883   : > { %v2028_v45 = vsel %vm2012_vm15, %v2004_v1, %v2020_v25 }
 0x884   : > { %v2036_v53 = vadd.f32 1.0, %v2028_v45 }
 0x886   : > { %v2044_v61 = vmul.f32 %v2036_v53, %v1732_v7 }
 0x888   : > { %v2048_v4 = vpack.c.bf16 %v2044_v61, %v2040_v58 }
 0x88a   : > { %2333 = vmatmul.bf16.vlgmr.msrb.gmra.mxu3 %v2048_v4 }
 0x8e4   : > { %v2348_v47 = vpop.f32.mrf.mxu0 }
 0x8ec   : > { %v2350_v8 = vpop.f32.mrf.mxu0 }
 0x8ef   : > { %v2362_v55 = vpop.f32.mrf.mxu1 }
 0x8f7   : > { %v2364_v16 = vpop.f32.mrf.mxu1 }
 0x8ff   : > { %v2320_v48 = vpop.f32.mrf.mxu2 }
 0x900   : > { %v2321_v52 = vadd.f32 %v3070_v19, %v2320_v48 }
 0x907   : > { %v2322_v63 = vpop.f32.mrf.mxu2 }
 0x908   : > { %v2323_v31 = vadd.f32 %v3070_v19, %v2322_v63 }
 0x90d   : > { %v2334_v59 = vpop.f32.mrf.mxu3 }
 0x90e   : > { %v2335_v50 = vadd.f32 %v2334_v59, %v2321_v52 }
 0x910   : > { %v2349_v12 = vadd.f32 %v2348_v47, %v2335_v50 }
 0x912   : > { %v2363_v0 = vadd.f32 %v2362_v55, %v2349_v12 }
 0x914   : > { %v2367_v54 = vadd.f32 %v2363_v0, %v3530_v46 }
 0x915   : > { %v2336_v34 = vpop.f32.mrf.mxu3 }
 0x916   : > { %2369 = vst [vmem:[%s3949_s13] sm:$0xff] %v2367_v54  ;;  %v2337_v15 = vadd.f32 %v2336_v34, %v2323_v31 }
 0x918   : > { %v2351_v14 = vadd.f32 %v2350_v8, %v2337_v15 }
 0x91a   : > { %v2365_v20 = vadd.f32 %v2364_v16, %v2351_v14 }
 0x91c   : > { %v2368_v10 = vadd.f32 %v2365_v20, %v3534_v49 }
 0x91e   : > { %2370 = vst [vmem:[%s3949_s13 + $0x8] sm:$0xff] %v2368_v10 }
 0x91f PF: > { %s3969_s24 = sld [smem:[#allocation3_spill]] }
 0x925   : > { %s23_s25 = sadd.s32 1, %s3969_s24  }
 0x926   : > { %p20_p5 = scmp.ge.s32.totalorder %s23_s25, 4  }
 0x928   :  { %22 = sbr.rel (!%p20_p5) target bundleno = 5 (0x5), region = 135 }

</bundles_post_ra>
